<compile_context>
chip_gen: v7x
topology: tpu7x:2x2x1
jax: 0.10.0
libtpu: 0.0.40
codegen_flags: <defaults>
</compile_context>

<pallas_src>
import functools

import numpy as np
import jax
import jax.numpy as jnp
from jax.experimental import pallas as pl
from jax.experimental.pallas import tpu as pltpu


# ---------------------------------------------------------------------------
# Fused kernel: project_in + depthwise 3x3 + GELU gate + project_out
# ---------------------------------------------------------------------------
def _ffn_fused_kernel(x_ref, top_ref, bot_ref, mask_ref,
                      w_pi_ref, b_pi_ref, w_dw_ref, b_dw_ref,
                      w_po_ref, b_po_ref,
                      o_ref,
                      ywp_ref,
                      *, W, TB, R, hidden, P0):
    """One (batch, row-band) grid step.

    x    : [1, C, TB]        flattened row-band of x (lane-dense)
    top  : [1, 1, C, W]      image row just above the band (clamped; zeroed here at border)
    bot  : [1, 1, C, W]      image row just below the band
    mask : [2, TB] int32     row 0: col != 0 ; row 1: col != W-1   (resident)
    w_pi [C2, C], b_pi [C2, 1]         project_in 1x1 conv
    w_dw [9, C2, 1], b_dw [C2, 1]      depthwise 3x3 conv (tap-major)
    w_po [C, hidden], b_po [C, 1]      project_out 1x1 conv
    o    : [1, C, TB]                  output band (lane-dense)
    ywp  : [C2, P0 + 2W + TB + P1]     VMEM scratch holding project_in output over
                                       [top halo | band | bottom halo]; band starts at the
                                       128-aligned offset P0 + W.
    """
    C2 = w_pi_ref.shape[0]
    r = pl.program_id(1)
    base = P0 + W                          # 128-aligned start of the central band

    w_pi = w_pi_ref[...]
    b_pi = b_pi_ref[...]

    # ---- project_in (1x1 conv) straight into the padded window scratch ----
    ywp_ref[:, base:base + TB] = (
        jnp.dot(w_pi, x_ref[0], preferred_element_type=jnp.float32) + b_pi)
    # top halo row (zero at the image border: torch zero-pads the dwconv INPUT,
    # which is the project_in output, so the halo must be zero — not b_pi).
    y_top = jnp.dot(w_pi, top_ref[0, 0], preferred_element_type=jnp.float32) + b_pi
    ywp_ref[:, P0:P0 + W] = jnp.where(r > 0, y_top, 0.0)
    # bottom halo row
    y_bot = jnp.dot(w_pi, bot_ref[0, 0], preferred_element_type=jnp.float32) + b_pi
    ywp_ref[:, base + TB:base + TB + W] = jnp.where(r < R - 1, y_bot, 0.0)

    # ---- depthwise 3x3 conv (cross-correlation, matching torch Conv2d) ----
    not_left = mask_ref[0:1, :] != 0       # tap reads column w-1 -> invalid at w == 0
    not_right = mask_ref[1:2, :] != 0      # tap reads column w+1 -> invalid at w == W-1

    acc = jnp.broadcast_to(b_dw_ref[...], (C2, TB))      # bias folded into init (hoisted)
    for di in range(3):
        for dj in range(3):
            start = base + (di - 1) * W + (dj - 1)
            tap = ywp_ref[:, start:start + TB]           # [C2, TB] lane slice of the window
            if dj == 0:
                tap = jnp.where(not_left, tap, 0.0)      # select -> NaN-safe vs pad garbage
            elif dj == 2:
                tap = jnp.where(not_right, tap, 0.0)
            acc = acc + w_dw_ref[di * 3 + dj] * tap      # per-channel scalar [C2,1]

    # ---- gated GELU + project_out (1x1 conv), fused epilogue ----
    x1 = acc[:hidden, :]
    x2 = acc[hidden:, :]
    # TODO(synk): torch F.gelu defaults to the exact erf form; the tanh approximation is
    # used here for a guaranteed Mosaic elementwise lowering (exp/tanh hit the EUP slot).
    gated = jax.nn.gelu(x1, approximate=True) * x2
    out = jnp.dot(w_po_ref[...], gated, preferred_element_type=jnp.float32) + b_po_ref[...]
    o_ref[0] = out.astype(o_ref.dtype)


# ---------------------------------------------------------------------------
# Band-size selection + pallas_call wrapper
# ---------------------------------------------------------------------------
def _pick_band_rows(H, W, target_lanes):
    """Largest row count TH dividing H with TH*W a multiple of 128 and <= target lanes."""
    best = None
    for th in range(1, H + 1):
        if H % th != 0:
            continue
        tb = th * W
        if tb % 128 != 0 or tb > max(target_lanes, 128):
            continue
        best = th
    if best is None:
        best = H          # whole image per band (block == full dim is always legal)
    return best


def feedforward_forward(x, params, target_band_lanes=2048):
    B, C, H, W = x.shape
    S = H * W
    hidden = params['w_po'].shape[1]
    C2 = 2 * hidden

    TH = _pick_band_rows(H, W, target_band_lanes)
    TB = TH * W
    R = H // TH
    xf = x.reshape(B, C, S)                               # lane-dense flattened layout (no copy)

    # Per-band halo rows (the single image row above / below each band). Tiny gather in the
    # wrapper (~2/TH of x) instead of re-reading whole neighbour bands inside the kernel.
    top_rows = np.maximum(np.arange(R) * TH - 1, 0)       # clamped; kernel zeroes at border
    bot_rows = np.minimum((np.arange(R) + 1) * TH, H - 1)
    top_halo = jnp.transpose(x[:, :, top_rows, :], (0, 2, 1, 3))   # (B, R, C, W)
    bot_halo = jnp.transpose(x[:, :, bot_rows, :], (0, 2, 1, 3))   # (B, R, C, W)

    # Horizontal-edge masks (same pattern for every band since TB is a multiple of W).
    col = np.arange(TB) % W
    edge_mask = jnp.asarray(
        np.stack([(col != 0), (col != W - 1)]).astype(np.int32))   # (2, TB)

    # Padded-window geometry: band starts at a 128-aligned lane offset.
    P0 = (-W) % 128
    if P0 == 0:
        P0 = 128
    win = P0 + 2 * W + TB
    P1 = (-win) % 128
    if P1 == 0:
        P1 = 128
    win_total = win + P1

    kernel = functools.partial(_ffn_fused_kernel, W=W, TB=TB, R=R, hidden=hidden, P0=P0)

    band = lambda b, r: (b, 0, r)
    halo = lambda b, r: (b, r, 0, 0)
    const2 = lambda b, r: (0, 0)
    const3 = lambda b, r: (0, 0, 0)

    out = pl.pallas_call(
        kernel,
        out_shape=jax.ShapeDtypeStruct((B, C, S), x.dtype),
        grid=(B, R),
        in_specs=[
            pl.BlockSpec((1, C, TB), band),        # current band of x
            pl.BlockSpec((1, 1, C, W), halo),      # top halo row
            pl.BlockSpec((1, 1, C, W), halo),      # bottom halo row
            pl.BlockSpec((2, TB), const2),         # edge masks (resident)
            pl.BlockSpec((C2, C), const2),         # w_pi   (resident: constant index map)
            pl.BlockSpec((C2, 1), const2),         # b_pi
            pl.BlockSpec((9, C2, 1), const3),      # w_dw
            pl.BlockSpec((C2, 1), const2),         # b_dw
            pl.BlockSpec((C, hidden), const2),     # w_po
            pl.BlockSpec((C, 1), const2),          # b_po
        ],
        out_specs=pl.BlockSpec((1, C, TB), band),
        scratch_shapes=[pltpu.VMEM((C2, win_total), jnp.float32)],
        compiler_params=pltpu.CompilerParams(
            dimension_semantics=("parallel", "parallel"),
            vmem_limit_bytes=64 * 1024 * 1024,
        ),
    )(xf, top_halo, bot_halo, edge_mask,
      params['w_pi'], params['b_pi'], params['w_dw'], params['b_dw'],
      params['w_po'], params['b_po'])
    return out.reshape(B, C, H, W)


# ---------------------------------------------------------------------------
# Pure-JAX reference (same math) for correctness check
# ---------------------------------------------------------------------------
def feedforward_reference(x, params):
    B, C, H, W = x.shape
    hidden = params['w_po'].shape[1]
    y = jnp.einsum('oc,bchw->bohw', params['w_pi'], x) + params['b_pi'].reshape(1, -1, 1, 1)
    yp = jnp.pad(y, ((0, 0), (0, 0), (1, 1), (1, 1)))
    acc = jnp.zeros_like(y)
    for di in range(3):
        for dj in range(3):
            wt = params['w_dw'][di * 3 + dj].reshape(1, -1, 1, 1)
            acc = acc + wt * yp[:, :, di:di + H, dj:dj + W]
    dwv = acc + params['b_dw'].reshape(1, -1, 1, 1)
    x1, x2 = dwv[:, :hidden], dwv[:, hidden:]
    g = jax.nn.gelu(x1, approximate=True) * x2
    out = jnp.einsum('oc,bchw->bohw', params['w_po'], g) + params['b_po'].reshape(1, -1, 1, 1)
    return out


# ---------------------------------------------------------------------------
# Deterministic parameter init (shapes from the PyTorch __init__, bias=True)
# ---------------------------------------------------------------------------
def init_params(key, dim, ffn_expansion_factor):
    hidden = int(dim * ffn_expansion_factor)
    C2 = 2 * hidden
    ks = jax.random.split(key, 6)
    w_pi_t = 0.1 * jax.random.normal(ks[0], (C2, dim, 1, 1), jnp.float32)   # Conv2d(dim, 2h, 1)
    b_pi = 0.1 * jax.random.normal(ks[1], (C2,), jnp.float32)
    w_dw_t = 0.1 * jax.random.normal(ks[2], (C2, 1, 3, 3), jnp.float32)     # depthwise (torch layout)
    b_dw = 0.1 * jax.random.normal(ks[3], (C2,), jnp.float32)
    w_po_t = 0.1 * jax.random.normal(ks[4], (dim, hidden, 1, 1), jnp.float32)  # Conv2d(h, dim, 1)
    b_po = 0.1 * jax.random.normal(ks[5], (dim,), jnp.float32)
    return dict(
        w_pi=w_pi_t.reshape(C2, dim),
        b_pi=b_pi.reshape(C2, 1),
        # [C2,1,3,3] -> tap-major [9, C2, 1]  (tap index t = ki*3 + kj)
        w_dw=jnp.transpose(w_dw_t.reshape(C2, 9), (1, 0)).reshape(9, C2, 1),
        b_dw=b_dw.reshape(C2, 1),
        w_po=w_po_t.reshape(dim, hidden),
        b_po=b_po.reshape(dim, 1),
    )


if __name__ == "__main__":
    B, dim, ffn_factor, H, W = 2, 4, 2.0, 16, 16
    key = jax.random.PRNGKey(0)
    kx, kp = jax.random.split(key)
    x = jax.random.normal(kx, (B, dim, H, W), jnp.float32)   # NCHW, like the torch module
    params = init_params(kp, dim, ffn_factor)

    ref = feedforward_reference(x, params)

    # Default band sizing (single lane-dense band at this toy size).
    fwd = jax.jit(functools.partial(feedforward_forward, target_band_lanes=2048))
    out = jax.block_until_ready(fwd(x, params))
    assert out.shape == (B, dim, H, W)
    err = float(jnp.max(jnp.abs(out - ref)))
    assert jnp.allclose(out, ref, atol=1e-3, rtol=1e-3), f"max abs err {err}"

    # Force two row-bands to exercise the halo / boundary-mask path.
    fwd2 = jax.jit(functools.partial(feedforward_forward, target_band_lanes=128))
    out2 = jax.block_until_ready(fwd2(x, params))
    err2 = float(jnp.max(jnp.abs(out2 - ref)))
    assert jnp.allclose(out2, ref, atol=1e-3, rtol=1e-3), f"max abs err {err2}"

    # Three row-bands (H=24) so an interior band uses real halo rows on BOTH sides.
    x3 = jax.random.normal(jax.random.PRNGKey(1), (B, dim, 24, W), jnp.float32)
    ref3 = feedforward_reference(x3, params)
    fwd3 = jax.jit(functools.partial(feedforward_forward, target_band_lanes=128))
    out3 = jax.block_until_ready(fwd3(x3, params))
    err3 = float(jnp.max(jnp.abs(out3 - ref3)))
    assert jnp.allclose(out3, ref3, atol=1e-3, rtol=1e-3), f"max abs err {err3}"

    print("KERNEL_OK")
</pallas_src>

<mosaic_0001>
module attributes {stable_mosaic.version = 11 : i64} {
  func.func @_ffn_fused_kernel(%arg0: i32, %arg1: i32, %arg2: memref<1x4x256xf32, #tpu.memory_space<vmem>>, %arg3: memref<1x1x4x16xf32, #tpu.memory_space<vmem>>, %arg4: memref<1x1x4x16xf32, #tpu.memory_space<vmem>>, %arg5: memref<2x256xi32, #tpu.memory_space<vmem>>, %arg6: memref<16x4xf32, #tpu.memory_space<vmem>>, %arg7: memref<16x1xf32, #tpu.memory_space<vmem>>, %arg8: memref<9x16x1xf32, #tpu.memory_space<vmem>>, %arg9: memref<16x1xf32, #tpu.memory_space<vmem>>, %arg10: memref<4x8xf32, #tpu.memory_space<vmem>>, %arg11: memref<4x1xf32, #tpu.memory_space<vmem>>, %arg12: memref<1x4x256xf32, #tpu.memory_space<vmem>>, %arg13: memref<16x512xf32, #tpu.memory_space<vmem>>) attributes {dimension_semantics = [#tpu.dimension_semantics<parallel>, #tpu.dimension_semantics<parallel>], iteration_bounds = array<i64: 2, 1>, scalar_prefetch = 0 : i64, scratch_operands = 1 : i64, tpu.core_type = #tpu.core_type<tc>, window_params = [{transform_indices = @transform_0, window_bounds = array<i64: 1, 4, 256>}, {transform_indices = @transform_1, window_bounds = array<i64: 1, 1, 4, 16>}, {transform_indices = @transform_2, window_bounds = array<i64: 1, 1, 4, 16>}, {pipeline_mode = #tpu.pipeline_mode<synchronous>, transform_indices = @transform_3, window_bounds = array<i64: 2, 256>}, {pipeline_mode = #tpu.pipeline_mode<synchronous>, transform_indices = @transform_4, window_bounds = array<i64: 16, 4>}, {pipeline_mode = #tpu.pipeline_mode<synchronous>, transform_indices = @transform_5, window_bounds = array<i64: 16, 1>}, {pipeline_mode = #tpu.pipeline_mode<synchronous>, transform_indices = @transform_6, window_bounds = array<i64: 9, 16, 1>}, {pipeline_mode = #tpu.pipeline_mode<synchronous>, transform_indices = @transform_7, window_bounds = array<i64: 16, 1>}, {pipeline_mode = #tpu.pipeline_mode<synchronous>, transform_indices = @transform_8, window_bounds = array<i64: 4, 8>}, {pipeline_mode = #tpu.pipeline_mode<synchronous>, transform_indices = @transform_9, window_bounds = array<i64: 4, 1>}, {transform_indices = @transform_10, window_bounds = array<i64: 1, 4, 256>}]} {
    %c0 = arith.constant 0 : index
    %c0_0 = arith.constant 0 : index
    %0 = vector.load %arg6[%c0, %c0_0] : memref<16x4xf32, #tpu.memory_space<vmem>>, vector<16x4xf32>
    %c0_1 = arith.constant 0 : index
    %c0_2 = arith.constant 0 : index
    %1 = vector.load %arg7[%c0_1, %c0_2] : memref<16x1xf32, #tpu.memory_space<vmem>>, vector<16x1xf32>
    %c0_3 = arith.constant 0 : index
    %c0_4 = arith.constant 0 : index
    %c0_5 = arith.constant 0 : index
    %2 = vector.load %arg2[%c0_3, %c0_4, %c0_5] : memref<1x4x256xf32, #tpu.memory_space<vmem>>, vector<1x4x256xf32>
    %3 = vector.shape_cast %2 : vector<1x4x256xf32> to vector<4x256xf32>
    %cst = arith.constant dense<0.000000e+00> : vector<16x256xf32>
    %4 = tpu.matmul %0, %3, %cst {dimension_numbers = #tpu.dot_dimension_numbers<[1], [0], [0], [1], [0, 0, 1, 1], [], []>} : vector<16x4xf32>, vector<4x256xf32>, vector<16x256xf32> -> vector<16x256xf32>
    %5 = vector.broadcast %1 : vector<16x1xf32> to vector<16x256xf32>
    %6 = arith.addf %4, %5 : vector<16x256xf32>
    %c0_6 = arith.constant 0 : index
    %c128 = arith.constant 128 : index
    %7 = vector.load %arg13[%c0_6, %c128] : memref<16x512xf32, #tpu.memory_space<vmem>>, vector<16x256xf32>
    tpu.vector_store %arg13[%c0_6, %c128], %6 {strides = array<i32>} : memref<16x512xf32, #tpu.memory_space<vmem>>, vector<16x256xf32>,
    %c0_7 = arith.constant 0 : index
    %c0_8 = arith.constant 0 : index
    %c0_9 = arith.constant 0 : index
    %c0_10 = arith.constant 0 : index
    %8 = vector.load %arg3[%c0_7, %c0_8, %c0_9, %c0_10] : memref<1x1x4x16xf32, #tpu.memory_space<vmem>>, vector<1x1x4x16xf32>
    %9 = vector.shape_cast %8 : vector<1x1x4x16xf32> to vector<4x16xf32>
    %cst_11 = arith.constant dense<0.000000e+00> : vector<16x16xf32>
    %10 = tpu.matmul %0, %9, %cst_11 {dimension_numbers = #tpu.dot_dimension_numbers<[1], [0], [0], [1], [0, 0, 1, 1], [], []>} : vector<16x4xf32>, vector<4x16xf32>, vector<16x16xf32> -> vector<16x16xf32>
    %11 = vector.broadcast %1 : vector<16x1xf32> to vector<16x16xf32>
    %12 = arith.addf %10, %11 : vector<16x16xf32>
    %c0_i32 = arith.constant 0 : i32
    %13 = arith.cmpi sgt, %arg1, %c0_i32 : i32
    %cst_12 = arith.constant 0.000000e+00 : f32
    %14 = vector.broadcast %cst_12 : f32 to vector<16x16xf32>
    %15 = arith.select %13, %12, %14 : vector<16x16xf32>
    %c0_13 = arith.constant 0 : index
    %c112 = arith.constant 112 : index
    %16 = vector.load %arg13[%c0_13, %c112] : memref<16x512xf32, #tpu.memory_space<vmem>>, vector<16x16xf32>
    tpu.vector_store %arg13[%c0_13, %c112], %15 {strides = array<i32>} : memref<16x512xf32, #tpu.memory_space<vmem>>, vector<16x16xf32>,
    %c0_14 = arith.constant 0 : index
    %c0_15 = arith.constant 0 : index
    %c0_16 = arith.constant 0 : index
    %c0_17 = arith.constant 0 : index
    %17 = vector.load %arg4[%c0_14, %c0_15, %c0_16, %c0_17] : memref<1x1x4x16xf32, #tpu.memory_space<vmem>>, vector<1x1x4x16xf32>
    %18 = vector.shape_cast %17 : vector<1x1x4x16xf32> to vector<4x16xf32>
    %cst_18 = arith.constant dense<0.000000e+00> : vector<16x16xf32>
    %19 = tpu.matmul %0, %18, %cst_18 {dimension_numbers = #tpu.dot_dimension_numbers<[1], [0], [0], [1], [0, 0, 1, 1], [], []>} : vector<16x4xf32>, vector<4x16xf32>, vector<16x16xf32> -> vector<16x16xf32>
    %20 = vector.broadcast %1 : vector<16x1xf32> to vector<16x16xf32>
    %21 = arith.addf %19, %20 : vector<16x16xf32>
    %c0_i32_19 = arith.constant 0 : i32
    %22 = arith.cmpi slt, %arg1, %c0_i32_19 : i32
    %cst_20 = arith.constant 0.000000e+00 : f32
    %23 = vector.broadcast %cst_20 : f32 to vector<16x16xf32>
    %24 = arith.select %22, %21, %23 : vector<16x16xf32>
    %c0_21 = arith.constant 0 : index
    %c384 = arith.constant 384 : index
    %25 = vector.load %arg13[%c0_21, %c384] : memref<16x512xf32, #tpu.memory_space<vmem>>, vector<16x16xf32>
    tpu.vector_store %arg13[%c0_21, %c384], %24 {strides = array<i32>} : memref<16x512xf32, #tpu.memory_space<vmem>>, vector<16x16xf32>,
    %c0_22 = arith.constant 0 : index
    %c0_23 = arith.constant 0 : index
    %26 = vector.load %arg5[%c0_22, %c0_23] : memref<2x256xi32, #tpu.memory_space<vmem>>, vector<1x256xi32>
    %c0_i32_24 = arith.constant 0 : i32
    %27 = vector.broadcast %c0_i32_24 : i32 to vector<1x256xi32>
    %28 = arith.cmpi ne, %26, %27 : vector<1x256xi32>
    %c1 = arith.constant 1 : index
    %c0_25 = arith.constant 0 : index
    %29 = vector.load %arg5[%c1, %c0_25] : memref<2x256xi32, #tpu.memory_space<vmem>>, vector<1x256xi32>
    %c0_i32_26 = arith.constant 0 : i32
    %30 = vector.broadcast %c0_i32_26 : i32 to vector<1x256xi32>
    %31 = arith.cmpi ne, %29, %30 : vector<1x256xi32>
    %c0_27 = arith.constant 0 : index
    %c0_28 = arith.constant 0 : index
    %32 = vector.load %arg9[%c0_27, %c0_28] : memref<16x1xf32, #tpu.memory_space<vmem>>, vector<16x1xf32>
    %33 = vector.shape_cast %32 : vector<16x1xf32> to vector<16x1xf32>
    %34 = vector.broadcast %33 : vector<16x1xf32> to vector<16x256xf32>
    %c0_29 = arith.constant 0 : index
    %c111 = arith.constant 111 : index
    %35 = vector.load %arg13[%c0_29, %c111] : memref<16x512xf32, #tpu.memory_space<vmem>>, vector<16x256xf32>
    %cst_30 = arith.constant 0.000000e+00 : f32
    %36 = vector.shape_cast %28 : vector<1x256xi1> to vector<1x256xi1>
    %37 = vector.broadcast %36 : vector<1x256xi1> to vector<16x256xi1>
    %38 = vector.broadcast %cst_30 : f32 to vector<16x256xf32>
    %39 = arith.select %37, %35, %38 : vector<16x256xi1>, vector<16x256xf32>
    %c0_31 = arith.constant 0 : index
    %c0_32 = arith.constant 0 : index
    %c0_33 = arith.constant 0 : index
    %40 = vector.load %arg8[%c0_31, %c0_32, %c0_33] : memref<9x16x1xf32, #tpu.memory_space<vmem>>, vector<1x16x1xf32>
    %41 = vector.shape_cast %40 : vector<1x16x1xf32> to vector<16x1xf32>
    %42 = vector.broadcast %41 : vector<16x1xf32> to vector<16x256xf32>
    %43 = arith.mulf %42, %39 : vector<16x256xf32>
    %44 = arith.addf %34, %43 : vector<16x256xf32>
    %c0_34 = arith.constant 0 : index
    %c112_35 = arith.constant 112 : index
    %45 = vector.load %arg13[%c0_34, %c112_35] : memref<16x512xf32, #tpu.memory_space<vmem>>, vector<16x256xf32>
    %c1_36 = arith.constant 1 : index
    %c0_37 = arith.constant 0 : index
    %c0_38 = arith.constant 0 : index
    %46 = vector.load %arg8[%c1_36, %c0_37, %c0_38] : memref<9x16x1xf32, #tpu.memory_space<vmem>>, vector<1x16x1xf32>
    %47 = vector.shape_cast %46 : vector<1x16x1xf32> to vector<16x1xf32>
    %48 = vector.broadcast %47 : vector<16x1xf32> to vector<16x256xf32>
    %49 = arith.mulf %48, %45 : vector<16x256xf32>
    %50 = arith.addf %44, %49 : vector<16x256xf32>
    %c0_39 = arith.constant 0 : index
    %c113 = arith.constant 113 : index
    %51 = vector.load %arg13[%c0_39, %c113] : memref<16x512xf32, #tpu.memory_space<vmem>>, vector<16x256xf32>
    %cst_40 = arith.constant 0.000000e+00 : f32
    %52 = vector.shape_cast %31 : vector<1x256xi1> to vector<1x256xi1>
    %53 = vector.broadcast %52 : vector<1x256xi1> to vector<16x256xi1>
    %54 = vector.broadcast %cst_40 : f32 to vector<16x256xf32>
    %55 = arith.select %53, %51, %54 : vector<16x256xi1>, vector<16x256xf32>
    %c2 = arith.constant 2 : index
    %c0_41 = arith.constant 0 : index
    %c0_42 = arith.constant 0 : index
    %56 = vector.load %arg8[%c2, %c0_41, %c0_42] : memref<9x16x1xf32, #tpu.memory_space<vmem>>, vector<1x16x1xf32>
    %57 = vector.shape_cast %56 : vector<1x16x1xf32> to vector<16x1xf32>
    %58 = vector.broadcast %57 : vector<16x1xf32> to vector<16x256xf32>
    %59 = arith.mulf %58, %55 : vector<16x256xf32>
    %60 = arith.addf %50, %59 : vector<16x256xf32>
    %c0_43 = arith.constant 0 : index
    %c127 = arith.constant 127 : index
    %61 = vector.load %arg13[%c0_43, %c127] : memref<16x512xf32, #tpu.memory_space<vmem>>, vector<16x256xf32>
    %cst_44 = arith.constant 0.000000e+00 : f32
    %62 = vector.shape_cast %28 : vector<1x256xi1> to vector<1x256xi1>
    %63 = vector.broadcast %62 : vector<1x256xi1> to vector<16x256xi1>
    %64 = vector.broadcast %cst_44 : f32 to vector<16x256xf32>
    %65 = arith.select %63, %61, %64 : vector<16x256xi1>, vector<16x256xf32>
    %c3 = arith.constant 3 : index
    %c0_45 = arith.constant 0 : index
    %c0_46 = arith.constant 0 : index
    %66 = vector.load %arg8[%c3, %c0_45, %c0_46] : memref<9x16x1xf32, #tpu.memory_space<vmem>>, vector<1x16x1xf32>
    %67 = vector.shape_cast %66 : vector<1x16x1xf32> to vector<16x1xf32>
    %68 = vector.broadcast %67 : vector<16x1xf32> to vector<16x256xf32>
    %69 = arith.mulf %68, %65 : vector<16x256xf32>
    %70 = arith.addf %60, %69 : vector<16x256xf32>
    %c0_47 = arith.constant 0 : index
    %c128_48 = arith.constant 128 : index
    %71 = vector.load %arg13[%c0_47, %c128_48] : memref<16x512xf32, #tpu.memory_space<vmem>>, vector<16x256xf32>
    %c4 = arith.constant 4 : index
    %c0_49 = arith.constant 0 : index
    %c0_50 = arith.constant 0 : index
    %72 = vector.load %arg8[%c4, %c0_49, %c0_50] : memref<9x16x1xf32, #tpu.memory_space<vmem>>, vector<1x16x1xf32>
    %73 = vector.shape_cast %72 : vector<1x16x1xf32> to vector<16x1xf32>
    %74 = vector.broadcast %73 : vector<16x1xf32> to vector<16x256xf32>
    %75 = arith.mulf %74, %71 : vector<16x256xf32>
    %76 = arith.addf %70, %75 : vector<16x256xf32>
    %c0_51 = arith.constant 0 : index
    %c129 = arith.constant 129 : index
    %77 = vector.load %arg13[%c0_51, %c129] : memref<16x512xf32, #tpu.memory_space<vmem>>, vector<16x256xf32>
    %cst_52 = arith.constant 0.000000e+00 : f32
    %78 = vector.shape_cast %31 : vector<1x256xi1> to vector<1x256xi1>
    %79 = vector.broadcast %78 : vector<1x256xi1> to vector<16x256xi1>
    %80 = vector.broadcast %cst_52 : f32 to vector<16x256xf32>
    %81 = arith.select %79, %77, %80 : vector<16x256xi1>, vector<16x256xf32>
    %c5 = arith.constant 5 : index
    %c0_53 = arith.constant 0 : index
    %c0_54 = arith.constant 0 : index
    %82 = vector.load %arg8[%c5, %c0_53, %c0_54] : memref<9x16x1xf32, #tpu.memory_space<vmem>>, vector<1x16x1xf32>
    %83 = vector.shape_cast %82 : vector<1x16x1xf32> to vector<16x1xf32>
    %84 = vector.broadcast %83 : vector<16x1xf32> to vector<16x256xf32>
    %85 = arith.mulf %84, %81 : vector<16x256xf32>
    %86 = arith.addf %76, %85 : vector<16x256xf32>
    %c0_55 = arith.constant 0 : index
    %c143 = arith.constant 143 : index
    %87 = vector.load %arg13[%c0_55, %c143] : memref<16x512xf32, #tpu.memory_space<vmem>>, vector<16x256xf32>
    %cst_56 = arith.constant 0.000000e+00 : f32
    %88 = vector.shape_cast %28 : vector<1x256xi1> to vector<1x256xi1>
    %89 = vector.broadcast %88 : vector<1x256xi1> to vector<16x256xi1>
    %90 = vector.broadcast %cst_56 : f32 to vector<16x256xf32>
    %91 = arith.select %89, %87, %90 : vector<16x256xi1>, vector<16x256xf32>
    %c6 = arith.constant 6 : index
    %c0_57 = arith.constant 0 : index
    %c0_58 = arith.constant 0 : index
    %92 = vector.load %arg8[%c6, %c0_57, %c0_58] : memref<9x16x1xf32, #tpu.memory_space<vmem>>, vector<1x16x1xf32>
    %93 = vector.shape_cast %92 : vector<1x16x1xf32> to vector<16x1xf32>
    %94 = vector.broadcast %93 : vector<16x1xf32> to vector<16x256xf32>
    %95 = arith.mulf %94, %91 : vector<16x256xf32>
    %96 = arith.addf %86, %95 : vector<16x256xf32>
    %c0_59 = arith.constant 0 : index
    %c144 = arith.constant 144 : index
    %97 = vector.load %arg13[%c0_59, %c144] : memref<16x512xf32, #tpu.memory_space<vmem>>, vector<16x256xf32>
    %c7 = arith.constant 7 : index
    %c0_60 = arith.constant 0 : index
    %c0_61 = arith.constant 0 : index
    %98 = vector.load %arg8[%c7, %c0_60, %c0_61] : memref<9x16x1xf32, #tpu.memory_space<vmem>>, vector<1x16x1xf32>
    %99 = vector.shape_cast %98 : vector<1x16x1xf32> to vector<16x1xf32>
    %100 = vector.broadcast %99 : vector<16x1xf32> to vector<16x256xf32>
    %101 = arith.mulf %100, %97 : vector<16x256xf32>
    %102 = arith.addf %96, %101 : vector<16x256xf32>
    %c0_62 = arith.constant 0 : index
    %c145 = arith.constant 145 : index
    %103 = vector.load %arg13[%c0_62, %c145] : memref<16x512xf32, #tpu.memory_space<vmem>>, vector<16x256xf32>
    %cst_63 = arith.constant 0.000000e+00 : f32
    %104 = vector.shape_cast %31 : vector<1x256xi1> to vector<1x256xi1>
    %105 = vector.broadcast %104 : vector<1x256xi1> to vector<16x256xi1>
    %106 = vector.broadcast %cst_63 : f32 to vector<16x256xf32>
    %107 = arith.select %105, %103, %106 : vector<16x256xi1>, vector<16x256xf32>
    %c8 = arith.constant 8 : index
    %c0_64 = arith.constant 0 : index
    %c0_65 = arith.constant 0 : index
    %108 = vector.load %arg8[%c8, %c0_64, %c0_65] : memref<9x16x1xf32, #tpu.memory_space<vmem>>, vector<1x16x1xf32>
    %109 = vector.shape_cast %108 : vector<1x16x1xf32> to vector<16x1xf32>
    %110 = vector.broadcast %109 : vector<16x1xf32> to vector<16x256xf32>
    %111 = arith.mulf %110, %107 : vector<16x256xf32>
    %112 = arith.addf %102, %111 : vector<16x256xf32>
    %113 = vector.extract_strided_slice %112 {offsets = [0, 0], sizes = [8, 256], strides = [1, 1]} : vector<16x256xf32> to vector<8x256xf32>
    %114 = vector.extract_strided_slice %112 {offsets = [8, 0], sizes = [8, 256], strides = [1, 1]} : vector<16x256xf32> to vector<8x256xf32>
    %115 = arith.mulf %113, %113 : vector<8x256xf32>
    %116 = arith.mulf %113, %115 : vector<8x256xf32>
    %cst_66 = arith.constant 4.471500e-02 : f32
    %117 = vector.broadcast %cst_66 : f32 to vector<8x256xf32>
    %118 = arith.mulf %117, %116 : vector<8x256xf32>
    %119 = arith.addf %113, %118 : vector<8x256xf32>
    %cst_67 = arith.constant 0.797884583 : f32
    %120 = vector.broadcast %cst_67 : f32 to vector<8x256xf32>
    %121 = arith.mulf %120, %119 : vector<8x256xf32>
    %122 = math.tanh %121 : vector<8x256xf32>
    %cst_68 = arith.constant 1.000000e+00 : f32
    %123 = vector.broadcast %cst_68 : f32 to vector<8x256xf32>
    %124 = arith.addf %123, %122 : vector<8x256xf32>
    %cst_69 = arith.constant 5.000000e-01 : f32
    %125 = vector.broadcast %cst_69 : f32 to vector<8x256xf32>
    %126 = arith.mulf %125, %124 : vector<8x256xf32>
    %127 = arith.mulf %113, %126 : vector<8x256xf32>
    %128 = arith.mulf %127, %114 : vector<8x256xf32>
    %c0_70 = arith.constant 0 : index
    %c0_71 = arith.constant 0 : index
    %129 = vector.load %arg10[%c0_70, %c0_71] : memref<4x8xf32, #tpu.memory_space<vmem>>, vector<4x8xf32>
    %cst_72 = arith.constant dense<0.000000e+00> : vector<4x256xf32>
    %130 = tpu.matmul %129, %128, %cst_72 {dimension_numbers = #tpu.dot_dimension_numbers<[1], [0], [0], [1], [0, 0, 1, 1], [], []>} : vector<4x8xf32>, vector<8x256xf32>, vector<4x256xf32> -> vector<4x256xf32>
    %c0_73 = arith.constant 0 : index
    %c0_74 = arith.constant 0 : index
    %131 = vector.load %arg11[%c0_73, %c0_74] : memref<4x1xf32, #tpu.memory_space<vmem>>, vector<4x1xf32>
    %132 = vector.broadcast %131 : vector<4x1xf32> to vector<4x256xf32>
    %133 = arith.addf %130, %132 : vector<4x256xf32>
    %c0_75 = arith.constant 0 : index
    %c0_76 = arith.constant 0 : index
    %c0_77 = arith.constant 0 : index
    %134 = vector.load %arg12[%c0_75, %c0_76, %c0_77] : memref<1x4x256xf32, #tpu.memory_space<vmem>>, vector<1x4x256xf32>
    %135 = vector.shape_cast %134 : vector<1x4x256xf32> to vector<4x256xf32>
    %136 = vector.shape_cast %133 : vector<4x256xf32> to vector<1x4x256xf32>
    tpu.vector_store %arg12[%c0_75, %c0_76, %c0_77], %136 {strides = array<i32>} : memref<1x4x256xf32, #tpu.memory_space<vmem>>, vector<1x4x256xf32>,
    return
  }
  func.func @transform_0(%arg0: i32, %arg1: i32) -> (i32, i32, i32) {
    %c0_i32 = arith.constant 0 : i32
    %c0_i32_0 = arith.constant 0 : i32
    return %arg0, %c0_i32, %arg1 : i32, i32, i32
  }
  func.func @transform_1(%arg0: i32, %arg1: i32) -> (i32, i32, i32, i32) {
    %c0_i32 = arith.constant 0 : i32
    %c0_i32_0 = arith.constant 0 : i32
    %c0_i32_1 = arith.constant 0 : i32
    return %arg0, %arg1, %c0_i32, %c0_i32_0 : i32, i32, i32, i32
  }
  func.func @transform_2(%arg0: i32, %arg1: i32) -> (i32, i32, i32, i32) {
    %c0_i32 = arith.constant 0 : i32
    %c0_i32_0 = arith.constant 0 : i32
    %c0_i32_1 = arith.constant 0 : i32
    return %arg0, %arg1, %c0_i32, %c0_i32_0 : i32, i32, i32, i32
  }
  func.func @transform_3(%arg0: i32, %arg1: i32) -> (i32, i32) {
    %c0_i32 = arith.constant 0 : i32
    %c0_i32_0 = arith.constant 0 : i32
    %c0_i32_1 = arith.constant 0 : i32
    return %c0_i32, %c0_i32_0 : i32, i32
  }
  func.func @transform_4(%arg0: i32, %arg1: i32) -> (i32, i32) {
    %c0_i32 = arith.constant 0 : i32
    %c0_i32_0 = arith.constant 0 : i32
    %c0_i32_1 = arith.constant 0 : i32
    return %c0_i32, %c0_i32_0 : i32, i32
  }
  func.func @transform_5(%arg0: i32, %arg1: i32) -> (i32, i32) {
    %c0_i32 = arith.constant 0 : i32
    %c0_i32_0 = arith.constant 0 : i32
    %c0_i32_1 = arith.constant 0 : i32
    return %c0_i32, %c0_i32_0 : i32, i32
  }
  func.func @transform_6(%arg0: i32, %arg1: i32) -> (i32, i32, i32) {
    %c0_i32 = arith.constant 0 : i32
    %c0_i32_0 = arith.constant 0 : i32
    %c0_i32_1 = arith.constant 0 : i32
    %c0_i32_2 = arith.constant 0 : i32
    return %c0_i32, %c0_i32_0, %c0_i32_1 : i32, i32, i32
  }
  func.func @transform_7(%arg0: i32, %arg1: i32) -> (i32, i32) {
    %c0_i32 = arith.constant 0 : i32
    %c0_i32_0 = arith.constant 0 : i32
    %c0_i32_1 = arith.constant 0 : i32
    return %c0_i32, %c0_i32_0 : i32, i32
  }
  func.func @transform_8(%arg0: i32, %arg1: i32) -> (i32, i32) {
    %c0_i32 = arith.constant 0 : i32
    %c0_i32_0 = arith.constant 0 : i32
    %c0_i32_1 = arith.constant 0 : i32
    return %c0_i32, %c0_i32_0 : i32, i32
  }
  func.func @transform_9(%arg0: i32, %arg1: i32) -> (i32, i32) {
    %c0_i32 = arith.constant 0 : i32
    %c0_i32_0 = arith.constant 0 : i32
    %c0_i32_1 = arith.constant 0 : i32
    return %c0_i32, %c0_i32_0 : i32, i32
  }
  func.func @transform_10(%arg0: i32, %arg1: i32) -> (i32, i32, i32) {
    %c0_i32 = arith.constant 0 : i32
    %c0_i32_0 = arith.constant 0 : i32
    return %arg0, %c0_i32, %arg1 : i32, i32, i32
  }
}

</mosaic_0001>

<bundles_post_ra>
// kernel: feedforward_forward.1
= control target key start
LH: loop header
LB: loop body
LE: loop exit
PB: predicated region body
PF: predicated region fallthrough
CT: control target
= control target key end

     0   :  { %s3129_s0 = inlined_call_operand.hbm [shape: f32[2,4,256], index: 0, kind: input, shape index: {}]   ;;  %s3130_s1 = inlined_call_operand.hbm [shape: f32[2,1,4,16], index: 1, kind: input, shape index: {}]   ;;  %s3131_s2 = inlined_call_operand.hbm [shape: f32[2,1,4,16], index: 2, kind: input, shape index: {}]   ;;  %s3132_s3 = inlined_call_operand.hbm [shape: s32[2,256], index: 3, kind: input, shape index: {}]   ;;  %s3133_s4 = inlined_call_operand.hbm [shape: f32[16,4], index: 4, kind: input, shape index: {}]   ;;  %s3134_s5 = inlined_call_operand.hbm [shape: f32[16,1], index: 5, kind: input, shape index: {}]   ;;  %s3135_s6 = inlined_call_operand.hbm [shape: f32[9,16,1], index: 6, kind: input, shape index: {}]   ;;  %s3136_s7 = inlined_call_operand.hbm [shape: f32[16,1], index: 7, kind: input, shape index: {}]   ;;  %s3137_s8 = inlined_call_operand.hbm [shape: f32[4,8], index: 8, kind: input, shape index: {}]   ;;  %s3138_s9 = inlined_call_operand.hbm [shape: f32[4,1], index: 9, kind: input, shape index: {}]   ;;  %s3139_s10 = inlined_call_operand.hbm [shape: f32[2,4,256], index: 10, kind: output, shape index: {}]  }
   0x1   :  { %3169 = sst [smem:[#allocation37_spill]] %s3130_s1 }
   0x2   :  { %3170 = sst [smem:[#allocation38_spill]] %s3132_s3 }
   0x3   :  { %3171 = sst [smem:[#allocation39_spill]] %s3134_s5 }
   0x4   :  { %3172 = sst [smem:[#allocation40_spill]] %s3136_s7 }
   0x5   :  { %3173 = sst [smem:[#allocation41_spill]] %s3139_s10 }
   0x6   :  { %15 = vsyncpa [#allocation4], 0 }
   0x7   :  { %17 = vsyncpa [#allocation4 + $0x1], 0 }
   0x8   :  { %18 = vsyncpa [#allocation7], 0 }
   0x9   :  { %20 = vsyncpa [#allocation7 + $0x1], 0 }
   0xa   :  { %21 = vsyncpa [#allocation10], 0 }
   0xb   :  { %22 = vsyncpa [#allocation13], 0 }
   0xc   :  { %23 = vsyncpa [#allocation16], 0 }
   0xd   :  { %24 = vsyncpa [#allocation19], 0 }
   0xe   :  { %25 = vsyncpa [#allocation5], 0 }
   0xf   :  { %27 = vsyncpa [#allocation5 + $0x1], 0  ;;  %s2340_s13 = smov 0   ;;  %s2342_s14 = smov 0  }
  0x10   :  { %s2344_s15 = smov 0   ;;  %s2346_s16 = smov 0  }
  0x11   :  { %s2348_s17 = smov 0   ;;  %s2350_s18 = smov 0  }
  0x12 LB: > { %3174 = sst [smem:[#allocation28_spill]] %s2240_s13  ;;  %s2371_s19 = sadd.s32 4294967295, %s2260_s18   ;;  %s2260_s18 = sphi %s2350_s18, %s33_s18   ;;  %s2256_s17 = sphi %s2348_s17, %s3231_s17   ;;  %s2252_s16 = sphi %s2346_s16, %s3230_s16   ;;  %s2248_s15 = sphi %s2344_s15, %s3226_s15   ;;  %s2244_s14 = sphi %s2342_s14, %s3229_s14   ;;  %s2240_s13 = sphi %s2340_s13, %s3228_s13  }
  0x13   : > { %3175 = sst [smem:[#allocation29_spill]] %s2248_s15  ;;  %p1643_p0 = scmp.ge.s32.totalorder %s2260_s18, 1 }
  0x14   : > { %3176 = sst [smem:[#allocation30_spill]] %s2252_s16  ;;  %p3140_p1 = scmp.eq.s32.totalorder %s2371_s19, 0 }
  0x15   : > { %3177 = sst [smem:[#allocation31_spill]] %s2260_s18  ;;  %p309_p2 = scmp.lt.s32.totalorder %s2260_s18, 3 }
  0x16   : > { %3178 = sst [smem:[#allocation32_spill]] %s2371_s19  ;;  %s2262_s21 = smov [#allocation9]  }
  0x17   : > { %p2376_p3 = pnand %p1643_p0, %p309_p2  ;;  %s322_s22 = sshll.u32 %s2262_s21, 4  ;;  %s323_s22 = int_to_ptr.vmem [resolvable:$true] %s322_s22 }
  0x18   : > { %s2263_s24 = smov [#allocation12]   ;;  %s2264_s26 = smov [#allocation15]  }
  0x19   : > { %s3179_s20 = scalar_select %p2376_p3, 1, 0 }
  0x1a   : > { %p1741_p5 = pneg %p2376_p3  ;;  %s345_s25 = sshll.u32 %s2263_s24, 4  ;;  %s2389_s25 = int_to_ptr.vmem [resolvable:$true] %s345_s25 }
  0x1b   : > { %s2391_s27 = sshll.u32 %s2264_s26, 4  ;;  %s3181_s3 = sld [smem:[#allocation38_spill]]  ;;  %s372_s27 = int_to_ptr.vmem [resolvable:$true] %s2391_s27 }
  0x1c   : > { %p2385_p6 = pnand %p1741_p5, %p3140_p1 }
  0x1e   : > { %s3180_s23 = scalar_select %p2385_p6, 1, 0 }
  0x1f   : > { %p2401_p8 = pneg %p2385_p6 }
  0x21   : > { %s1872_s30 = scalar_lea.hbm %s3181_s3, 64 }
  0x22   : > { %p1873_p7 = scmp.ne.s32.totalorder %s3181_s3, %s1872_s30  ;;  %p1879_p11 = scmp.lt.u32.totalorder %s1872_s30, %s3181_s3 }
  0x23   : > { %s3182_s21 = scalar_select %p2401_p8, 1, 0 }
  0x24   : > { %p1875_p9 = pnand %p2401_p8, %p1873_p7 }
  0x26   : > { %p1876_p10 = pneg %p1875_p9 }
  0x28   : > { %p1881_p12 = pnand %p1879_p11, %p1876_p10 }
  0x2a   : > { %1884 = shalt.err (!%p1881_p12)
}
  0x2b   : > { %s1885_s28 = scalar_lea.vmem %s323_s22, 64  ;;  %p1893_p5 = scmp.lt.s32.totalorder %s323_s22, %s323_s22 }
  0x2c   : > { %p1886_p13 = scmp.ne.s32.totalorder %s323_s22, %s1885_s28  ;;  %p1894_p4 = scmp.lt.s32.totalorder %s1885_s28, %s1885_s28 }
  0x2e   : > { %p1888_p0 = pnand %p1886_p13, %p2401_p8  ;;  %p1895_p1 = por %p1894_p4, %p1893_p5 }
  0x30   : > { %p1889_p2 = pneg %p1888_p0 }
  0x32   : > { %p1896_p3 = pnand %p1895_p1, %p1889_p2 }
  0x34   : > { %1899 = shalt.err (!%p1896_p3)
}
  0x35   : > { %1744 = dma.hbm_to_vmem [thread:$0]  (!%p2385_p6), %s3181_s3, 64, %s323_s22, [#allocation10]  }
  0x36   : > { %s3183_s5 = sld [smem:[#allocation39_spill]] }
  0x3c   : > { %s1900_s24 = scalar_lea.hbm %s3183_s5, 256 }
  0x3d   : > { %p1901_p7 = scmp.ne.s32.totalorder %s3183_s5, %s1900_s24  ;;  %p1907_p1 = scmp.lt.u32.totalorder %s1900_s24, %s3183_s5 }
  0x3f   : > { %p1903_p9 = pnand %p1901_p7, %p2401_p8 }
  0x41   : > { %p1904_p4 = pneg %p1903_p9 }
  0x43   : > { %p1909_p3 = pnand %p1907_p1, %p1904_p4 }
  0x45   : > { %1912 = shalt.err (!%p1909_p3)
}
  0x46   : > { %s1913_s22 = scalar_lea.vmem %s2389_s25, 256  ;;  %p1921_p13 = scmp.lt.s32.totalorder %s2389_s25, %s2389_s25 }
  0x47   : > { %p1914_p10 = scmp.ne.s32.totalorder %s2389_s25, %s1913_s22  ;;  %p1922_p0 = scmp.lt.s32.totalorder %s1913_s22, %s1913_s22 }
  0x49   : > { %p1916_p11 = pnand %p1914_p10, %p2401_p8  ;;  %p1923_p2 = por %p1922_p0, %p1921_p13 }
  0x4b   : > { %p1917_p12 = pneg %p1916_p11 }
  0x4d   : > { %p1924_p5 = pnand %p1923_p2, %p1917_p12 }
  0x4f   : > { %1927 = shalt.err (!%p1924_p5)
}
  0x50   : > { %s3143_s10 = smov 128   ;;  %s3145_s16 = smov 8  }
  0x51   : > { %1750 = dma.hbm_to_vmem [thread:$0]  (!%p2385_p6), %s3183_s5, 256, %s2389_s25, [#allocation13], %s3143_s10, %s3143_s10, %s3145_s16  }
  0x52   : > { %s3184_s7 = sld [smem:[#allocation40_spill]] }
  0x58   : > { %s1928_s24 = scalar_lea.hbm %s3184_s7, 256 }
  0x59   : > { %p1929_p7 = scmp.ne.s32.totalorder %s3184_s7, %s1928_s24  ;;  %p1935_p1 = scmp.lt.u32.totalorder %s1928_s24, %s3184_s7 }
  0x5b   : > { %p1931_p9 = pnand %p1929_p7, %p2401_p8 }
  0x5d   : > { %p1932_p4 = pneg %p1931_p9 }
  0x5f   : > { %p1937_p3 = pnand %p1935_p1, %p1932_p4 }
  0x61   : > { %1940 = shalt.err (!%p1937_p3)
}
  0x62   : > { %s1941_s29 = scalar_lea.vmem %s372_s27, 256  ;;  %p1949_p13 = scmp.lt.s32.totalorder %s372_s27, %s372_s27 }
  0x63   : > { %p1942_p10 = scmp.ne.s32.totalorder %s372_s27, %s1941_s29  ;;  %p1950_p0 = scmp.lt.s32.totalorder %s1941_s29, %s1941_s29 }
  0x65   : > { %p1944_p11 = pnand %p1942_p10, %p2401_p8  ;;  %p1951_p2 = por %p1950_p0, %p1949_p13 }
  0x67   : > { %p1945_p12 = pneg %p1944_p11 }
  0x69   : > { %p1952_p5 = pnand %p1951_p2, %p1945_p12 }
  0x6b   : > { %1955 = shalt.err (!%p1952_p5)
}
  0x6c   : > { %1756 = dma.hbm_to_vmem [thread:$0]  (!%p2385_p6), %s3184_s7, 256, %s372_s27, [#allocation16], %s3143_s10, %s3143_s10, %s3145_s16  }
  0x6d   : > { %s1642_s11 = sadd.s32 4294967294, %s2260_s18   ;;  %s45_s30 = sadd.s32 1, %s2256_s17 }
  0x6e   : > { %s54_s12 = sadd.s32 1, %s2248_s15  ;;  %p47_p7 = scmp.ge.s32.totalorder %s45_s30, 2 }
  0x6f   : > { %p61_p9 = scmp.ne.s32.totalorder %s2248_s15, %s2244_s14  ;;  %p62_p4 = scmp.eq.s32.totalorder %s2260_s18, 0 }
  0x70   : > { %p67_p1 = scmp.ne.s32.totalorder %s2244_s14, %s2240_s13  ;;  %s3233_s30 = smov (%p47_p7, %s45_s30), 0 }
  0x71   : > { %3185 = sst [smem:[#allocation33_spill]] %s3233_s30  ;;  %p63_p3 = por %p62_p4, %p61_p9 }
  0x72   : > { %p3186_p10 = scmp.eq.s32.totalorder %s2371_s19, 0  ;;  %s49_s27 = ssub.s32 %s2256_s17, %s3233_s30 }
  0x73   : > { %p296_p12 = scmp.eq.s32.totalorder %s2371_s19, 1  ;;  %p52_p13 = scmp.eq.s32.totalorder %s49_s27, 0 }
  0x74   : > { %p2477_p11 = por %p3186_p10, %p67_p1  ;;  %p302_p0 = scmp.eq.s32.totalorder %s1642_s11, 1 }
  0x75   : > { %p2484_p2 = por %p296_p12, %p61_p9  ;;  %p1784_p5 = scmp.lt.s32.totalorder %s2260_s18, 2 }
  0x76   : > { %s3187_s24 = scalar_select %p2477_p11, 1, 0 }
  0x77   : > { %s3188_s26 = scalar_select %p2484_p2, 1, 0 }
  0x78   : > { %s2490_s28 = scalar_select %p52_p13, %s2248_s15, %s54_s12  }
  0x79   : > { %3189 = sst [smem:[#allocation34_spill]] %s3188_s26  ;;  %p2492_p7 = por %p302_p0, %p67_p1 }
  0x7a   : > { %3190 = sst [smem:[#allocation35_spill]] %s2490_s28  ;;  %s2497_s29 = sand.u32 1, %s2248_s15  }
  0x7b   : > { %s3191_s22 = scalar_select %p2492_p7, 1, 0 }
  0x7c   : > { %p2499_p4 = pnand %p1784_p5, %p63_p3  ;;  %s428_s25 = sand.u32 1, %s2260_s18  }
  0x7d   : > { %3192 = sst [smem:[#allocation36_spill]] %s3191_s22  ;;  %s3148_s11 = sshll.u32 %s2497_s29, 2 }
  0x7e   : > { %s3193_s3 = scalar_select %p2499_p4, 1, 0 }
  0x7f   : > { %s3149_s27 = sshll.u32 %s2256_s17, 6  ;;  %s432_s10 = scalar_lea.vmem [#allocation6], %s3148_s11 }
  0x80   : > { %s440_s12 = sshll.u32 %s432_s10, 4  ;;  %s3194_s1 = sld [smem:[#allocation37_spill]]  ;;  %s2515_s12 = int_to_ptr.vmem [resolvable:$true] %s440_s12 }
  0x81   : > { %s2517_s30 = scalar_lea.sflag [#allocation7], %s428_s25  ;;  %p2523_p1 = pneg %p2499_p4 }
  0x83   : > { %s3195_s11 = scalar_select %p2523_p1, 1, 0 }
  0x86   : > { %s2513_s7 = scalar_lea.hbm %s3194_s1, %s3149_s27  ;;  %s1961_s16 = scalar_lea.hbm %s3194_s1, 128 }
  0x87   : > { %s1956_s28 = scalar_lea.hbm %s2513_s7, 64  ;;  %p1962_p12 = scmp.lt.u32.totalorder %s2513_s7, %s3194_s1 }
  0x88   : > { %p1957_p9 = scmp.ne.s32.totalorder %s2513_s7, %s1956_s28  ;;  %p1963_p13 = scmp.lt.u32.totalorder %s1961_s16, %s1956_s28 }
  0x89   : > { %p1965_p5 = scmp.lt.u32.totalorder %s1956_s28, %s2513_s7 }
  0x8a   : > { %p1959_p3 = pnand %p2523_p1, %p1957_p9  ;;  %p1964_p0 = por %p1963_p13, %p1962_p12 }
  0x8c   : > { %p1960_p10 = pneg %p1959_p3  ;;  %p1966_p7 = por %p1965_p5, %p1964_p0 }
  0x8e   : > { %p1967_p2 = pnand %p1966_p7, %p1960_p10 }
  0x90   : > { %1970 = shalt.err (!%p1967_p2)
}
  0x91   : > { %s1971_s25 = scalar_lea.vmem %s2515_s12, 64  ;;  %s2267_s5 = smov [#allocation6]  }
  0x92   : > { %p1972_p9 = scmp.ne.s32.totalorder %s2515_s12, %s1971_s25  ;;  %s1976_s10 = sshll.u32 %s2267_s5, 4  ;;  %s1977_s10 = int_to_ptr.vmem [resolvable:$false] %s1976_s10 }
  0x93   : > { %s1978_s15 = scalar_lea.vmem %s1977_s10, 128  ;;  %p1979_p6 = scmp.lt.s32.totalorder %s2515_s12, %s1977_s10 }
  0x94   : > { %p1974_p3 = pnand %p1972_p9, %p2523_p1  ;;  %p1980_p8 = scmp.lt.s32.totalorder %s1978_s15, %s1971_s25 }
  0x96   : > { %p1975_p11 = pneg %p1974_p3  ;;  %p1981_p12 = por %p1980_p8, %p1979_p6 }
  0x98   : > { %p1982_p13 = pnand %p1981_p12, %p1975_p11 }
  0x9a   : > { %1985 = shalt.err (!%p1982_p13)
}
  0x9b   : > { %1769 = dma.hbm_to_vmem [thread:$0]  (!%p2499_p4), %s2513_s7, 64, %s2515_s12, %s2517_s30  }
  0x9c   : > { %s3196_s28 = sshll.u32 %s2256_s17, 6  ;;  %s2268_s1 = smov [#allocation11]  }
  0x9d   : > { %s2552_s5 = scalar_lea.hbm %s3131_s2, %s3196_s28  ;;  %s332_s10 = sshll.u32 %s2268_s1, 4  ;;  %s333_s10 = int_to_ptr.vmem [resolvable:$true] %s332_s10 }
  0x9e   : > { %s2269_s25 = smov [#allocation14]   ;;  %s1986_s13 = scalar_lea.hbm %s3133_s4, 256 }
  0x9f   : > { %s358_s15 = sshll.u32 %s2269_s25, 4  ;;  %p1987_p6 = scmp.ne.s32.totalorder %s3133_s4, %s1986_s13  ;;  %s2554_s15 = int_to_ptr.vmem [resolvable:$true] %s358_s15 }
  0xa0   : > { %p3197_p8 = scmp.ne.s32.totalorder %s3182_s21, 0  ;;  %p1993_p7 = scmp.lt.u32.totalorder %s1986_s13, %s3133_s4 }
  0xa2   : > { %p1989_p11 = pnand %p1987_p6, %p3197_p8 }
  0xa4   : > { %p1990_p2 = pneg %p1989_p11 }
  0xa6   : > { %p1995_p10 = pnand %p1993_p7, %p1990_p2 }
  0xa8   : > { %1998 = shalt.err (!%p1995_p10)
}
  0xa9   : > { %s1999_s1 = scalar_lea.vmem %s333_s10, 256  ;;  %p2007_p3 = scmp.lt.s32.totalorder %s333_s10, %s333_s10 }
  0xaa   : > { %p2000_p0 = scmp.ne.s32.totalorder %s333_s10, %s1999_s1  ;;  %p2008_p12 = scmp.lt.s32.totalorder %s1999_s1, %s1999_s1 }
  0xac   : > { %p2002_p5 = pnand %p2000_p0, %p3197_p8  ;;  %p2009_p13 = por %p2008_p12, %p2007_p3 }
  0xae   : > { %p2003_p9 = pneg %p2002_p5 }
  0xb0   : > { %p2010_p4 = pnand %p2009_p13, %p2003_p9 }
  0xb2   : > { %2013 = shalt.err (!%p2010_p4)
}
  0xb3   : > { %p3198_p6 = scmp.ne.s32.totalorder %s3180_s23, 0  ;;  %s3199_s18 = smov 8  }
  0xb4   : > { %s3200_s19 = smov 128   ;;  %s2014_s27 = scalar_lea.hbm %s3135_s6, 2304 }
  0xb5   : > { %1747 = dma.hbm_to_vmem [thread:$0]  (!%p3198_p6), %s3133_s4, 256, %s333_s10, [#allocation10], %s3200_s19, %s3200_s19, %s3199_s18  }
  0xb6   : > { %p2015_p11 = scmp.ne.s32.totalorder %s3135_s6, %s2014_s27  ;;  %p2021_p7 = scmp.lt.u32.totalorder %s2014_s27, %s3135_s6 }
  0xb8   : > { %p2017_p4 = pnand %p2015_p11, %p3197_p8 }
  0xba   : > { %p2018_p2 = pneg %p2017_p4 }
  0xbc   : > { %p2023_p10 = pnand %p2021_p7, %p2018_p2 }
  0xbe   : > { %2026 = shalt.err (!%p2023_p10)
}
  0xbf   : > { %s2027_s10 = scalar_lea.vmem %s2554_s15, 2304  ;;  %p2035_p3 = scmp.lt.s32.totalorder %s2554_s15, %s2554_s15 }
  0xc0   : > { %p2028_p0 = scmp.ne.s32.totalorder %s2554_s15, %s2027_s10  ;;  %p2036_p12 = scmp.lt.s32.totalorder %s2027_s10, %s2027_s10 }
  0xc2   : > { %p2030_p5 = pnand %p2028_p0, %p3197_p8  ;;  %p2037_p13 = por %p2036_p12, %p2035_p3 }
  0xc4   : > { %p2031_p9 = pneg %p2030_p5 }
  0xc6   : > { %p2038_p11 = pnand %p2037_p13, %p2031_p9 }
  0xc8   : > { %2041 = shalt.err (!%p2038_p11)
}
  0xc9   : > { %1753 = dma.hbm_to_vmem [thread:$0]  (!%p3198_p6), %s3135_s6, 2304, %s2554_s15, [#allocation13], %s3200_s19, %s3200_s19, %s3199_s18  }
  0xca   : > { %s2270_s13 = smov [#allocation17]   ;;  %s2271_s28 = smov [#allocation18]  }
  0xcb   : > { %s385_s22 = sshll.u32 %s2270_s13, 4  ;;  %s396_s27 = sshll.u32 %s2271_s28, 4  ;;  %s386_s22 = int_to_ptr.vmem [resolvable:$true] %s385_s22  ;;  %s2603_s27 = int_to_ptr.vmem [resolvable:$true] %s396_s27 }
  0xcc   : > { %s2042_s7 = scalar_lea.hbm %s3137_s8, 64 }
  0xcd   : > { %p2043_p4 = scmp.ne.s32.totalorder %s3137_s8, %s2042_s7  ;;  %p2049_p10 = scmp.lt.u32.totalorder %s2042_s7, %s3137_s8 }
  0xcf   : > { %p2045_p2 = pnand %p2043_p4, %p3197_p8 }
  0xd1   : > { %p2046_p7 = pneg %p2045_p2 }
  0xd3   : > { %p2051_p0 = pnand %p2049_p10, %p2046_p7 }
  0xd5   : > { %2054 = shalt.err (!%p2051_p0)
}
  0xd6   : > { %s2055_s18 = scalar_lea.vmem %s386_s22, 64  ;;  %p2063_p12 = scmp.lt.s32.totalorder %s386_s22, %s386_s22 }
  0xd7   : > { %p2056_p5 = scmp.ne.s32.totalorder %s386_s22, %s2055_s18  ;;  %p2064_p13 = scmp.lt.s32.totalorder %s2055_s18, %s2055_s18 }
  0xd9   : > { %p2058_p9 = pnand %p2056_p5, %p3197_p8  ;;  %p2065_p11 = por %p2064_p13, %p2063_p12 }
  0xdb   : > { %p2059_p3 = pneg %p2058_p9 }
  0xdd   : > { %p2066_p1 = pnand %p2065_p11, %p2059_p3 }
  0xdf   : > { %2069 = shalt.err (!%p2066_p1)
}
  0xe0   : > { %1759 = dma.hbm_to_vmem [thread:$0]  (!%p3198_p6), %s3137_s8, 64, %s386_s22, [#allocation16]  }
  0xe1   : > { %s2070_s16 = scalar_lea.hbm %s3138_s9, 64 }
  0xe2   : > { %p2071_p4 = scmp.ne.s32.totalorder %s3138_s9, %s2070_s16  ;;  %p2077_p1 = scmp.lt.u32.totalorder %s2070_s16, %s3138_s9 }
  0xe4   : > { %p2073_p2 = pnand %p2071_p4, %p3197_p8 }
  0xe6   : > { %p2074_p7 = pneg %p2073_p2 }
  0xe8   : > { %p2079_p10 = pnand %p2077_p1, %p2074_p7 }
  0xea   : > { %2082 = shalt.err (!%p2079_p10)
}
  0xeb   : > { %s2083_s22 = scalar_lea.vmem %s2603_s27, 64  ;;  %p2091_p3 = scmp.lt.s32.totalorder %s2603_s27, %s2603_s27 }
  0xec   : > { %p2084_p0 = scmp.ne.s32.totalorder %s2603_s27, %s2083_s22  ;;  %p2092_p12 = scmp.lt.s32.totalorder %s2083_s22, %s2083_s22 }
  0xee   : > { %p2086_p5 = pnand %p2084_p0, %p3197_p8  ;;  %p2093_p13 = por %p2092_p12, %p2091_p3 }
  0xf0   : > { %p2087_p9 = pneg %p2086_p5 }
  0xf2   : > { %p2094_p11 = pnand %p2093_p13, %p2087_p9 }
  0xf4   : > { %2097 = shalt.err (!%p2094_p11)
}
  0xf5   : > { %1762 = dma.hbm_to_vmem [thread:$0]  (!%p3198_p6), %s3138_s9, 64, %s2603_s27, [#allocation19]  }
  0xf6   : > { %s1652_s21 = sshll.u32 %s2497_s29, 3  ;;  %s1687_s18 = sshll.u32 %s2256_s17, 7 }
  0xf7   : > { %s2651_s13 = scalar_lea.hbm %s3129_s0, %s1687_s18  ;;  %s411_s23 = scalar_lea.vmem [#allocation3], %s1652_s21 }
  0xf8   : > { %s421_s28 = sshll.u32 %s411_s23, 4  ;;  %s3201_s16 = sshll.u32 %s2497_s29, 2  ;;  %s2653_s28 = int_to_ptr.vmem [resolvable:$true] %s421_s28 }
  0xf9   : > { %s2657_s25 = scalar_lea.vmem [#allocation8], %s3201_s16  ;;  %s408_s7 = scalar_lea.sflag [#allocation4], %s2497_s29 }
  0xfa   : > { %s459_s27 = sshll.u32 %s2657_s25, 4  ;;  %s2098_s12 = scalar_lea.hbm %s2651_s13, 128  ;;  %s460_s27 = int_to_ptr.vmem [resolvable:$true] %s459_s27 }
  0xfb   : > { %p2099_p8 = scmp.ne.s32.totalorder %s2651_s13, %s2098_s12  ;;  %p3202_p6 = scmp.ne.s32.totalorder %s3195_s11, 0 }
  0xfc   : > { %s2103_s1 = scalar_lea.hbm %s3129_s0, 256  ;;  %p2104_p7 = scmp.lt.u32.totalorder %s2651_s13, %s3129_s0 }
  0xfd   : > { %p2101_p4 = pnand %p2099_p8, %p3202_p6  ;;  %p2105_p1 = scmp.lt.u32.totalorder %s2103_s1, %s2098_s12 }
  0xfe   : > { %p2107_p0 = scmp.lt.u32.totalorder %s2098_s12, %s2651_s13 }
  0xff   : > { %p2102_p2 = pneg %p2101_p4  ;;  %p2106_p10 = por %p2105_p1, %p2104_p7 }
 0x101   : > { %p2108_p5 = por %p2107_p0, %p2106_p10 }
 0x103   : > { %p2109_p9 = pnand %p2108_p5, %p2102_p2 }
 0x105   : > { %2112 = shalt.err (!%p2109_p9)
}
 0x106   : > { %s2113_s29 = scalar_lea.vmem %s2653_s28, 128  ;;  %s2272_s18 = smov [#allocation3]  }
 0x107   : > { %p2114_p3 = scmp.ne.s32.totalorder %s2653_s28, %s2113_s29  ;;  %s2118_s19 = sshll.u32 %s2272_s18, 4  ;;  %s2119_s19 = int_to_ptr.vmem [resolvable:$false] %s2118_s19 }
 0x108   : > { %s2120_s26 = scalar_lea.vmem %s2119_s19, 256  ;;  %p2121_p11 = scmp.lt.s32.totalorder %s2653_s28, %s2119_s19 }
 0x109   : > { %p2116_p12 = pnand %p2114_p3, %p3202_p6  ;;  %p2122_p8 = scmp.lt.s32.totalorder %s2120_s26, %s2113_s29 }
 0x10b   : > { %p2117_p13 = pneg %p2116_p12  ;;  %p2123_p4 = por %p2122_p8, %p2121_p11 }
 0x10d   : > { %p2124_p7 = pnand %p2123_p4, %p2117_p13 }
 0x10f   : > { %2127 = shalt.err (!%p2124_p7)
}
 0x110   : > { %p3203_p2 = scmp.ne.s32.totalorder %s3193_s3, 0  ;;  %s2128_s23 = scalar_lea.hbm %s2552_s5, 64 }
 0x111   : > { %p2129_p1 = scmp.ne.s32.totalorder %s2552_s5, %s2128_s23  ;;  %s2133_s10 = scalar_lea.hbm %s3131_s2, 128 }
 0x112   : > { %1766 = dma.hbm_to_vmem [thread:$0]  (!%p3203_p2), %s2651_s13, 128, %s2653_s28, %s408_s7  }
 0x113   : > { %p2131_p10 = pnand %p2129_p1, %p3202_p6  ;;  %p2134_p5 = scmp.lt.u32.totalorder %s2552_s5, %s3131_s2 }
 0x114   : > { %p2135_p9 = scmp.lt.u32.totalorder %s2133_s10, %s2128_s23  ;;  %p2137_p12 = scmp.lt.u32.totalorder %s2128_s23, %s2552_s5 }
 0x115   : > { %p2132_p0 = pneg %p2131_p10 }
 0x116   : > { %p2136_p3 = por %p2135_p9, %p2134_p5 }
 0x118   : > { %p2138_p13 = por %p2137_p12, %p2136_p3 }
 0x11a   : > { %p2139_p11 = pnand %p2138_p13, %p2132_p0 }
 0x11c   : > { %2142 = shalt.err (!%p2139_p11)
}
 0x11d   : > { %s2143_s13 = scalar_lea.vmem %s460_s27, 64  ;;  %s2273_s28 = smov [#allocation8]  }
 0x11e   : > { %p2144_p8 = scmp.ne.s32.totalorder %s460_s27, %s2143_s13  ;;  %s2148_s25 = sshll.u32 %s2273_s28, 4  ;;  %s2149_s25 = int_to_ptr.vmem [resolvable:$false] %s2148_s25 }
 0x11f   : > { %s2150_s7 = scalar_lea.vmem %s2149_s25, 128  ;;  %p2151_p1 = scmp.lt.s32.totalorder %s460_s27, %s2149_s25 }
 0x120   : > { %p2146_p4 = pnand %p2144_p8, %p3202_p6  ;;  %p2152_p10 = scmp.lt.s32.totalorder %s2150_s7, %s2143_s13 }
 0x122   : > { %p2147_p7 = pneg %p2146_p4  ;;  %p2153_p2 = por %p2152_p10, %p2151_p1 }
 0x124   : > { %p2154_p5 = pnand %p2153_p2, %p2147_p7 }
 0x126   : > { %2157 = shalt.err (!%p2154_p5)
}
 0x127   : > { %p3204_p9 = scmp.ne.s32.totalorder %s3193_s3, 0  ;;  %p3205_p0 = scmp.ne.s32.totalorder %s3179_s20, 0 }
 0x128   : > { %s2705_s11 = sand.u32 (!%p3205_p0), 1, %s2244_s14   ;;  %p3206_p6 = scmp.ne.s32.totalorder (!%p3205_p0), %s3187_s24, 0 }
 0x129   : > { %1772 = dma.hbm_to_vmem [thread:$0]  (!%p3204_p9), %s2552_s5, 64, %s460_s27, %s2517_s30  }
 0x12a   : > { %468 = sbr.rel (%p3205_p0) target bundleno = 976 (0x3d0), region = 60  ;;  %s1660_s15 = sshll.u32 (!%p3205_p0), %s2705_s11, 3 }
 0x12b   : > { %s471_s21 = scalar_lea.sflag (!%p3205_p0), [#allocation4], %s2705_s11  ;;  %s474_s29 = scalar_lea.vmem (!%p3205_p0), [#allocation3], %s1660_s15 }
 0x131   : > { %2211 = dma.done.wait (%p3206_p6), %s471_s21, 128  }
 0x132   : > { %2213 = vsyncadd (%p3206_p6), %s471_s21, 4294967168  ;;  %s3207_s30 = sld [smem:[#allocation32_spill]]  ;;  %s1661_s3 = sshll.u32 %s2705_s11, 2 }
 0x133   : > { %s2717_s27 = scalar_lea.vmem [#allocation6], %s1661_s3 }
 0x138   : > { %s479_s20 = sand.u32 1, %s3207_s30  }
 0x139   : > { %s480_s5 = scalar_lea.sflag [#allocation7], %s479_s20 }
 0x13a   : > { %2215 = dma.done.wait (%p3206_p6), %s480_s5, 128  }
 0x13b   : > { %2217 = vsyncadd (%p3206_p6), %s480_s5, 4294967168  ;;  %s2723_s18 = scalar_lea.vmem [#allocation8], %s1661_s3  ;;  %p3208_p2 = scmp.eq.s32.totalorder %s3207_s30, 0 }
 0x13d   : > { %2219 = dma.done.wait (%p3208_p2), [#allocation10], 320   ;;  %p3209_p3 = pmov %p3208_p2 }
 0x13e   : > { %p3210_p12 = pmov %p3208_p2 }
 0x13f   : > { %2221 = vsyncadd (%p3209_p3), [#allocation10], 4294966976 }
 0x140   : > { %2223 = dma.done.wait (%p3210_p12), [#allocation13], 2560   ;;  %p3211_p13 = pmov %p3208_p2 }
 0x141   : > { %p3212_p11 = pmov %p3208_p2 }
 0x142   : > { %2225 = vsyncadd (%p3211_p13), [#allocation13], 4294964736 }
 0x143   : > { %2227 = dma.done.wait (%p3212_p11), [#allocation16], 320   ;;  %p3213_p8 = pmov %p3208_p2 }
 0x144   : > { %p3214_p4 = pmov %p3208_p2 }
 0x145   : > { %2229 = vsyncadd (%p3213_p8), [#allocation16], 4294966976 }
 0x146   : > { %2231 = dma.done.wait (%p3214_p4), [#allocation19], 64   ;;  %p3215_p7 = pmov %p3208_p2 }
 0x147   : > { %vm860_vm0 = vcmask 130048   ;;  %v2274_v0 = vmov 0.0   ;;  %v2275_v1 = vmov 0   ;;  %s2276_s24 = smov 112   ;;  %v573_v2 = vld [vmem:[%s474_s29] sm:$0xff]  ;;  %vm593_vm1 = vcmask 1043456  }
 0x148   : > { %2233 = vsyncadd (%p3215_p7), [#allocation19], 4294967232  ;;  %662 = vmatprep.mubr.f32.mxu0 %v2274_v0  ;;  %861 = vst.msk [vmem:[#allocation2 + $0x18] sm:$0xff] %vm860_vm0, %v2274_v0  ;;  %1866 = vset.pattern.permute.xlu1 %v2275_v1  ;;  %v2746_v3 = vld [vmem:[#allocation11] sm:$0xff]  ;;  %vm586_vm2 = vcmask 31744   ;;  %v585_v4 = vcombine.high %v573_v2, %v573_v2  ;;  %v949_v5 = vld [vmem:[#allocation14 + $0x10] sm:$0xff] }
 0x149   : > { %862 = vst.msk [vmem:[#allocation2 + $0x38] sm:$0xff] %vm860_vm0, %v2274_v0  ;;  %1865 = vset.pattern.permute.xlu0 %v2275_v1  ;;  %1697 = vmatprep.mubr.msk.f32.mxu1 %vm586_vm2, %v2746_v3  ;;  %v571_v6 = vld [vmem:[#allocation12] sm:$0xff]  ;;  %v2754_v8 = vld [vmem:[#allocation11 + $0x8] sm:$0xff]  ;;  %v572_v9 = vld [vmem:[#allocation12 + $0x8] sm:$0xff]  ;;  %s2277_s19 = smov 111   ;;  %s2278_s26 = smov 127  }
 0x14a   : > { %1861 = vrot.lane.b32.xlu0 %v2274_v0, %s2276_s24  ;;  %1671 = vmatprep.subr.msk.mxu0 %vm593_vm1, %v585_v4  ;;  %v1226_v7 = vld [vmem:[#allocation14 + $0x70] sm:$0xff]  ;;  %v950_v10 = vld [vmem:[#allocation14 + $0x18] sm:$0xff]  ;;  %v928_v12 = vld [vmem:[#allocation14] sm:$0xff]  ;;  %s2279_s23 = smov 113   ;;  %vm772_vm3 = vcmask 1048448   ;;  %s2280_s16 = smov 17  }
 0x14b   : > { %953 = vperm.xlu1 %1866, %v949_v5   ;;  %1672 = vmatpush1.msk.msra.mxu0 %vm593_vm1, %v573_v2  ;;  %v1227_v11 = vld [vmem:[#allocation14 + $0x78] sm:$0xff]  ;;  %v868_v13 = vld [vmem:[#allocation15] sm:$0xff]  ;;  %v1034_v14 = vld [vmem:[#allocation14 + $0x20] sm:$0xff]  ;;  %s2281_s12 = smov 15   ;;  %s2282_s10 = smov 1   ;;  %vm915_vm6 = vcmask 138240  }
 0x14c   : > { %1673 = vmatmul.mubr.msk.f32.vlgmr.msra.gmra.mrb[0].mxu0 %vm586_vm2, %v2746_v3  ;;  %v1101_v15 = vld [vmem:[#allocation14 + $0x40] sm:$0xff]  ;;  %v1080_v16 = vld [vmem:[#allocation14 + $0x30] sm:$0xff]  ;;  %v869_v20 = vld [vmem:[#allocation15 + $0x8] sm:$0xff]  ;;  %s2283_s22 = smov 16   ;;  %vm1020_vm8 = vcmask 121856   ;;  %vm1066_vm9 = vcmask 7168  }
 0x14d   : > { %668 = vmatprep.mubr.f32.mxu0 %v2274_v0  ;;  %v1159_v17 = vld [vmem:[#allocation14 + $0x50] sm:$0xff]  ;;  %v1205_v18 = vld [vmem:[#allocation14 + $0x60] sm:$0xff]  ;;  %v1102_v22 = vld [vmem:[#allocation14 + $0x48] sm:$0xff]  ;;  %vm1145_vm11 = vcmask 1039360   ;;  %vm1191_vm13 = vcmask 924672   ;;  %vm1287_vm15 = vcmask 908288  }
 0x14e   : > { %576 = vperm.xlu0 %1865, %v571_v6   ;;  %v1301_v21 = vld [vmem:[#allocation14 + $0x80] sm:$0xff]  ;;  %v1160_v23 = vld [vmem:[#allocation14 + $0x58] sm:$0xff]  ;;  %v929_v24 = vld [vmem:[#allocation14 + $0x8] sm:$0xff]  ;;  %s3216_s1 = sld [smem:[#allocation30_spill]]  ;;  %s3217_s13 = sld [smem:[#allocation34_spill]] }
 0x14f   : > { %1230 = vperm.xlu1 %1866, %v1226_v7   ;;  %v1123_v19 = vld [vmem:[#allocation2 + $0x18] sm:$0xff]  ;;  %v1035_v25 = vld [vmem:[#allocation14 + $0x28] sm:$0xff]  ;;  %s566_s25 = scalar_lea.vmem [#allocation20], %s1660_s15  ;;  %s3218_s30 = sld [smem:[#allocation41_spill]] }
 0x150   : > { %1674 = vmatmul.mubr.msk.f32.gmra.mrb[2].mxu0 %vm586_vm2, %v2754_v8  ;;  %v1081_v26 = vld [vmem:[#allocation14 + $0x38] sm:$0xff]  ;;  %v1206_v27 = vld [vmem:[#allocation14 + $0x68] sm:$0xff]  ;;  %s1445_s7 = sshll.u32 %s566_s25, 4  ;;  %s1429_s3 = scalar_lea.sflag [#allocation5], %s2705_s11  ;;  %s3082_s7 = int_to_ptr.vmem [resolvable:$true] %s1445_s7 }
 0x151   : > { %1416 = vmatprep.mubr.f32.mxu0 %v2274_v0  ;;  %v2761_v28 = vld [vmem:[#allocation2 + $0x38] sm:$0xff]  ;;  %v1302_v60 = vld [vmem:[#allocation14 + $0x88] sm:$0xff]  ;;  %s2158_s5 = scalar_lea.vmem %s3082_s7, 128  ;;  %s2284_s15 = smov [#allocation20]  }
 0x152   : > { %581 = vperm.xlu0 %1865, %v572_v9   ;;  %p2159_p1 = scmp.ne.s32.totalorder %s3082_s7, %s2158_s5 }
 0x153   : > { %958 = vperm.xlu1 %1866, %v950_v10  }
 0x154   : > { %s1688_s28 = sshll.u32 %s3216_s1, 7  ;;  %p3219_p10 = scmp.ne.s32.totalorder %s3217_s13, 0 }
 0x155   : > { %s3080_s20 = scalar_lea.hbm %s3218_s30, %s1688_s28 }
 0x156   : > { %1235 = vperm.xlu0 %1865, %v1227_v11   ;;  %p2160_p5 = pnand %p2159_p1, %p3219_p10 }
 0x157   : > { %932 = vperm.xlu1 %1866, %v928_v12  }
 0x158   : > { %p2161_p9 = pneg %p2160_p5 }
 0x15a   : > { %872 = vperm.xlu0 %1865, %v868_v13   ;;  %v1342_v13 = vld [vmem:[#allocation18] sm:$0xf] }
 0x15b   : > { %1038 = vperm.xlu1 %1866, %v1034_v14  }
 0x15e   : > { %1105 = vperm.xlu0 %1865, %v1101_v15  }
 0x15f   : > { %1084 = vperm.xlu1 %1866, %v1080_v16  }
 0x162   : > { %1163 = vperm.xlu0 %1865, %v1159_v17   ;;  %v679_v17 = vld [vmem:[%s2717_s27] sm:$0xf]  ;;  %s2162_s27 = sshll.u32 %s2284_s15, 4  ;;  %s2163_s27 = int_to_ptr.vmem [resolvable:$false] %s2162_s27 }
 0x163   : > { %1209 = vperm.xlu1 %1866, %v1205_v18   ;;  %1695 = vmatprep.subr.msk.mxu1 %vm593_vm1, %v679_v17  ;;  %v775_v18 = vld [vmem:[%s2723_s18] sm:$0xf]  ;;  %s2164_s18 = scalar_lea.vmem %s2163_s27, 256  ;;  %p2165_p0 = scmp.lt.s32.totalorder %s3082_s7, %s2163_s27 }
 0x164   : > { %1696 = vmatpush3.msk.msra.mxu1 %vm593_vm1, %v679_v17  ;;  %p2166_p6 = scmp.lt.s32.totalorder %s2164_s18, %s2158_s5 }
 0x165   : > { %1698 = vmatmul.mubr.msk.f32.vlgmr.msra.gmra.mrb[0].mxu1 %vm586_vm2, %v2754_v8  ;;  %1700 = vmatprep.subr.msk.mxu1 %vm593_vm1, %v775_v18 }
 0x166   : > { %1279 = vrot.lane.b32.xlu0 %v1123_v19, %s2277_s19  ;;  %1701 = vmatpush3.msk.msra.mxu1 %vm593_vm1, %v775_v18  ;;  %vm1262_vm1 = vcmask 916480   ;;  %p2167_p2 = por %p2166_p6, %p2165_p0 }
 0x167   : > { %1137 = vrot.lane.b32.xlu1 %v1123_v19, %s2278_s26  ;;  %1702 = vmatprep.mubr.msk.f32.mxu1 %vm586_vm2, %v2746_v3 }
 0x168   : > { %p2168_p3 = pnand %p2167_p2, %p2161_p9 }
 0x169   : > { %1703 = vmatmul.mubr.msk.f32.vlgmr.msra.gmra.mrb[2].mxu1 %vm586_vm2, %v2754_v8 }
 0x16a   : > { %877 = vperm.xlu0 %1865, %v869_v20  }
 0x16b   : > { %1305 = vperm.xlu1 %1866, %v1301_v21  }
 0x16e   : > { %1110 = vperm.xlu0 %1865, %v1102_v22  }
 0x16f   : > { %1183 = vrot.lane.b32.xlu1 %v1123_v19, %s2279_s23 }
 0x172   : > { %1168 = vperm.xlu0 %1865, %v1160_v23  }
 0x173   : > { %937 = vperm.xlu1 %1866, %v929_v24  }
 0x177   : > { %1043 = vperm.xlu1 %1866, %v1035_v25  }
 0x17b   : > { %1089 = vperm.xlu1 %1866, %v1081_v26  }
 0x17f   : > { %1214 = vperm.xlu1 %1866, %v1206_v27  }
 0x183   : > { %1143 = vrot.lane.b32.xlu1 %v2761_v28, %s2278_s26 }
 0x1bc   : > { %v1862_v29 = vpop.permute.xlu0 %1861 }
 0x1bd   : > { %v1864_v30 = vunpack.i.h.bf16 %v1862_v29  ;;  %v1863_v31 = vunpack.i.l.bf16 %v1862_v29 }
 0x1bf   : > { %773 = vst.msk [vmem:[#allocation2] sm:$0xff] %vm772_vm3, %v1863_v31  ;;  %774 = vst.msk [vmem:[#allocation2 + $0x20] sm:$0xff] %vm772_vm3, %v1864_v30  ;;  %v887_v30 = vlaneseq }
 0x1c6   : > { %v880_v32 = vld [vmem:[#allocation2] sm:$0xff] }
 0x1c7   : > { %903 = vrot.lane.b32.xlu0 %v880_v32, %s2280_s16  ;;  %1008 = vrot.lane.b32.xlu1 %v880_v32, %s2281_s12  ;;  %v883_v33 = vld [vmem:[#allocation2 + $0x20] sm:$0xff] }
 0x1ca   : > { %v954_v34 = vpop.permute.xlu1 %953 }
 0x1cb   : > { %1054 = vrot.lane.b32.xlu0 %v880_v32, %s2282_s10  ;;  %1014 = vrot.lane.b32.xlu1 %v883_v33, %s2281_s12  ;;  %v961_v35 = vmul.f32 %v954_v34, %v880_v32  ;;  %v863_v32 = vld [vmem:[#allocation9] ss:$2 sm:$0x3] }
 0x1cc   : > { %vm864_vm4 = vcmp.ne.s32.totalorder %v863_v32, 0 }
 0x1cd   : > { %v577_v40 = vpop.permute.xlu0 %576 }
 0x1ce   : > { %v1231_v36 = vpop.permute.xlu1 %1230 }
 0x1cf   : > { %909 = vrot.lane.b32.xlu0 %v883_v33, %s2280_s16  ;;  %973 = vrot.lane.b32.xlu1 %v961_v35, %s2283_s22  ;;  %v1240_v37 = vmul.f32 %v1231_v36, %v1123_v19 }
 0x1d1   : > { %v582_v41 = vpop.permute.xlu0 %581 }
 0x1d2   : > { %v2773_v38 = vpop.permute.xlu1 %958 }
 0x1d3   : > { %1060 = vrot.lane.b32.xlu0 %v883_v33, %s2282_s10  ;;  %v964_v39 = vmul.f32 %v2773_v38, %v883_v33  ;;  %v888_v33 = vshrl.u32 %v887_v30, 7 }
 0x1d5   : > { %979 = vrot.lane.b32.xlu1 %v964_v39, %s2283_s22  ;;  %v2777_v42 = vpop.permute.xlu0 %1235 }
 0x1d6   : > { %v2824_v61 = vpop.permute.xlu1 %932  ;;  %v1243_v15 = vmul.f32 %v2777_v42, %v2761_v28 }
 0x1d7   : > { %1254 = vrot.lane.b32.xlu0 %v1240_v37, %s2276_s24  ;;  %v866_v37 = vld [vmem:[#allocation9 + $0x1] ss:$2 sm:$0x3] }
 0x1d8   : > { %vm867_vm5 = vcmp.ne.s32.totalorder %v866_v37, 0 }
 0x1d9   : > { %v2779_v43 = vpop.permute.xlu0 %872 }
 0x1da   : > { %v2829_v63 = vpop.permute.xlu1 %1038 }
 0x1dd   : > { %v2781_v44 = vpop.permute.xlu0 %1105 }
 0x1de   : > { %v2838_v4 = vpop.permute.xlu1 %1084 }
 0x1e1   : > { %v2783_v45 = vpop.permute.xlu0 %1163 }
 0x1e2   : > { %v2844_v5 = vpop.permute.xlu1 %1209 }
 0x1e5   : > { %v2785_v46 = vpop.permute.xlu0 %1279 }
 0x1e6   : > { %v2852_v6 = vpop.permute.xlu1 %1137 }
 0x1e9   : > { %v2787_v47 = vpop.permute.xlu0 %877 }
 0x1ea   : > { %v2858_v9 = vpop.permute.xlu1 %1305 }
 0x1ed   : > { %v1111_v55 = vpop.permute.xlu0 %1110 }
 0x1ee   : > { %v2865_v11 = vpop.permute.xlu1 %1183 }
 0x1f1   : > { %v2901_v22 = vpop.permute.xlu0 %1168 }
 0x1f2   : > { %v2871_v14 = vpop.permute.xlu1 %937 }
 0x1f6   : > { %v2879_v16 = vpop.permute.xlu1 %1043 }
 0x1fa   : > { %v2894_v20 = vpop.permute.xlu1 %1089 }
 0x1fe   : > { %v2899_v21 = vpop.permute.xlu1 %1214 }
 0x202   : > { %v2903_v23 = vpop.permute.xlu1 %1143 }
 0x21f   : > { %v664_v48 = vpop.f32.mrb[0].mxu0 }
 0x220   : > { %v2789_v49 = vadd.f32 %v664_v48, %v577_v40  ;;  %v666_v50 = vpop.f32.mrb[1].mxu0 }
 0x221   : > { %v2791_v51 = vadd.f32 %v666_v50, %v577_v40  ;;  %v997_v50 = vsel %vm867_vm5, 1, %v2275_v1 }
 0x222   : > { %1010 = vrot.lane.b32.xlu1 %v2789_v49, %s2281_s12  ;;  %905 = vrot.lane.b32.xlu0 %v2789_v49, %s2280_s16  ;;  %v962_v59 = vmul.f32 %v954_v34, %v2789_v49  ;;  %v1238_v62 = vmul.f32 %v1231_v36, %v2789_v49 }
 0x223   : > { %v670_v52 = vpop.f32.mrb[2].mxu0  ;;  %v963_v0 = vmul.f32 %v954_v34, %v2791_v51  ;;  %v1239_v2 = vmul.f32 %v1231_v36, %v2791_v51  ;;  %v889_v36 = vsub.s32 0, %v888_v33 }
 0x224   : > { %v2797_v53 = vadd.f32 %v670_v52, %v582_v41  ;;  %v672_v54 = vpop.f32.mrb[3].mxu0 }
 0x225   : > { %v673_v56 = vadd.f32 %v672_v54, %v582_v41 }
 0x226   : > { %1275 = vrot.lane.b32.xlu1 %v2789_v49, %s2277_s19  ;;  %1056 = vrot.lane.b32.xlu0 %v2789_v49, %s2282_s10  ;;  %v2804_v57 = vmul.f32 %v1111_v55, %v2797_v53  ;;  %v965_v7 = vmul.f32 %v2773_v38, %v2797_v53  ;;  %v1241_v19 = vmul.f32 %v2777_v42, %v2797_v53 }
 0x227   : > { %v2806_v58 = vmul.f32 %v1111_v55, %v673_v56  ;;  %v1242_v10 = vmul.f32 %v2777_v42, %v673_v56  ;;  %v966_v12 = vmul.f32 %v2773_v38, %v673_v56  ;;  %v886_v38 = vsel %vm864_vm4, 1, %v2275_v1 }
 0x228   : > { %v2918_v41 = vrot.slane %v886_v38, %v889_v36 }
 0x22a   : > { %907 = vrot.lane.b32.xlu1 %v2791_v51, %s2280_s16  ;;  %1133 = vrot.lane.b32.xlu0 %v2789_v49, %s2278_s26  ;;  %vm895_vm7 = vcmp.eq.s32.totalorder %v2918_v41, 1 }
 0x22e   : > { %1058 = vrot.lane.b32.xlu1 %v2791_v51, %s2282_s10  ;;  %1179 = vrot.lane.b32.xlu0 %v2789_v49, %s2279_s23 }
 0x232   : > { %1277 = vrot.lane.b32.xlu1 %v2791_v51, %s2277_s19  ;;  %1012 = vrot.lane.b32.xlu0 %v2791_v51, %s2281_s12 }
 0x236   : > { %1135 = vrot.lane.b32.xlu0 %v2791_v51, %s2278_s26  ;;  %975 = vrot.lane.b32.xlu1 %v962_v59, %s2283_s22 }
 0x239   : > { %v904_v24 = vpop.permute.xlu0 %903  ;;  %v1009_v25 = vpop.permute.xlu1 %1008 }
 0x23a   : > { %1181 = vrot.lane.b32.xlu0 %v2791_v51, %s2279_s23  ;;  %1310 = vperm.xlu1 %1866, %v1302_v60  }
 0x23d   : > { %v1055_v26 = vpop.permute.xlu0 %1054  ;;  %v2905_v27 = vpop.permute.xlu1 %1014 }
 0x23e   : > { %1250 = vrot.lane.b32.xlu0 %v1238_v62, %s2276_s24  ;;  %1189 = vrot.lane.b32.xlu1 %v2761_v28, %s2279_s23 }
 0x241   : > { %v974_v3 = vpop.permute.xlu1 %973 }
 0x242   : > { %977 = vrot.lane.b32.xlu0 %v963_v0, %s2283_s22  ;;  %1252 = vrot.lane.b32.xlu1 %v1239_v2, %s2276_s24 }
 0x246   : > { %911 = vrot.lane.b32.xlu0 %v2797_v53, %s2280_s16  ;;  %1016 = vrot.lane.b32.xlu1 %v2797_v53, %s2281_s12 }
 0x247   : > { %v2911_v31 = vpop.permute.xlu1 %979 }
 0x24a   : > { %1062 = vrot.lane.b32.xlu0 %v2797_v53, %s2282_s10  ;;  %913 = vrot.lane.b32.xlu1 %v673_v56, %s2280_s16 }
 0x24e   : > { %1139 = vrot.lane.b32.xlu0 %v2797_v53, %s2278_s26  ;;  %1064 = vrot.lane.b32.xlu1 %v673_v56, %s2282_s10 }
 0x252   : > { %1018 = vrot.lane.b32.xlu0 %v673_v56, %s2281_s12  ;;  %981 = vrot.lane.b32.xlu1 %v965_v7, %s2283_s22 }
 0x256   : > { %1141 = vrot.lane.b32.xlu0 %v673_v56, %s2278_s26  ;;  %1283 = vrot.lane.b32.xlu1 %v673_v56, %s2277_s19 }
 0x25a   : > { %1187 = vrot.lane.b32.xlu0 %v673_v56, %s2279_s23  ;;  %1258 = vrot.lane.b32.xlu1 %v1242_v10, %s2276_s24  ;;  %v893_v56 = vsub.s32 1, %v888_v33 }
 0x25c   : > { %v2930_v2 = vrot.slane %v886_v38, %v893_v56  ;;  %v2943_v30 = vrot.slane %v997_v50, %v893_v56 }
 0x25e   : > { %983 = vrot.lane.b32.xlu0 %v966_v12, %s2283_s22  ;;  %1281 = vrot.lane.b32.xlu1 %v2797_v53, %s2277_s19  ;;  %vm896_vm12 = vcmp.eq.s32.totalorder %v2930_v2, 1  ;;  %vm1007_vm14 = vcmp.eq.s32.totalorder %v2943_v30, 1 }
 0x262   : > { %1185 = vrot.lane.b32.xlu0 %v2797_v53, %s2279_s23  ;;  %1345 = vperm.xlu1 %1866, %v1342_v13   ;;  %v2923_v53 = vrot.slane %v997_v50, %v889_v36 }
 0x264   : > { %vm1006_vm10 = vcmp.eq.s32.totalorder %v2923_v53, 1 }
 0x266   : > { %1285 = vrot.lane.b32.xlu0 %v2761_v28, %s2277_s19  ;;  %v2907_v28 = vpop.permute.xlu0 %909 }
 0x26a   : > { %1260 = vrot.lane.b32.xlu0 %v1243_v15, %s2276_s24  ;;  %v2909_v29 = vpop.permute.xlu0 %1060 }
 0x26e   : > { %1256 = vrot.lane.b32.xlu0 %v1241_v19, %s2276_s24  ;;  %v2913_v8 = vpop.permute.xlu0 %1254 }
 0x294   : > { %v1011_v34 = vpop.permute.xlu1 %1010  ;;  %v906_v35 = vpop.permute.xlu0 %905 }
 0x295   : > { %v916_v52 = vsel %vm915_vm6, %v904_v24, %v906_v35  ;;  %v1021_v60 = vsel %vm1020_vm8, %v1009_v25, %v1011_v34 }
 0x296   : > { %v924_v59 = vsel %vm895_vm7, %v916_v52, 0.0  ;;  %v1029_v10 = vsel %vm1006_vm10, %v1021_v60, 0.0 }
 0x297   : > { %v940_v1 = vmul.f32 %v2824_v61, %v924_v59  ;;  %v1046_v19 = vmul.f32 %v2829_v63, %v1029_v10 }
 0x298   : > { %v2916_v39 = vpop.permute.xlu1 %1275  ;;  %v1057_v40 = vpop.permute.xlu0 %1056 }
 0x299   : > { %v1067_v7 = vsel %vm1066_vm9, %v1055_v26, %v1057_v40  ;;  %v944_v13 = vadd.f32 %v940_v1, %v2779_v43 }
 0x29a   : > { %v1075_v17 = vsel %vm895_vm7, %v1067_v7, 0.0 }
 0x29b   : > { %v1092_v32 = vmul.f32 %v2838_v4, %v1075_v17 }
 0x29c   : > { %v908_v42 = vpop.permute.xlu1 %907  ;;  %v1134_v48 = vpop.permute.xlu0 %1133 }
 0x29d   : > { %v917_v24 = vsel %vm915_vm6, %v906_v35, %v908_v42  ;;  %v1113_v35 = vmul.f32 %v2781_v44, %v2789_v49 }
 0x29e   : > { %v925_v37 = vsel %vm896_vm12, %v917_v24, 0.0 }
 0x2a0   : > { %v1059_v54 = vpop.permute.xlu1 %1058  ;;  %v1180_v55 = vpop.permute.xlu0 %1179 }
 0x2a1   : > { %v1068_v1 = vsel %vm1066_vm9, %v1057_v40, %v1059_v54 }
 0x2a4   : > { %v1278_v62 = vpop.permute.xlu1 %1277  ;;  %v1013_v0 = vpop.permute.xlu0 %1012 }
 0x2a5   : > { %v1022_v50 = vsel %vm1020_vm8, %v1011_v34, %v1013_v0 }
 0x2a6   : > { %v1030_v49 = vsel %vm1007_vm14, %v1022_v50, 0.0 }
 0x2a7   : > { %v1047_v0 = vmul.f32 %v2829_v63, %v1030_v49  ;;  %v1114_v63 = vmul.f32 %v2781_v44, %v2791_v51 }
 0x2a8   : > { %v1136_v12 = vpop.permute.xlu0 %1135  ;;  %v976_v15 = vpop.permute.xlu1 %975 }
 0x2a9   : > { %v985_v18 = vsel %vm860_vm0, %v974_v3, %v976_v15  ;;  %v1146_v25 = vsel %vm1145_vm11, %v1134_v48, %v1136_v12  ;;  %v941_v48 = vmul.f32 %v2824_v61, %v925_v37  ;;  %v1076_v61 = vsel %vm896_vm12, %v1068_v1, 0.0 }
 0x2aa   : > { %v993_v26 = vadd.f32 %v985_v18, %v944_v13  ;;  %v1154_v3 = vsel %vm1006_vm10, %v1146_v25, 0.0  ;;  %v1147_v40 = vsel %vm1145_vm11, %v1136_v12, %v2852_v6  ;;  %v1093_v18 = vmul.f32 %v2838_v4, %v1076_v61 }
 0x2ab   : > { %v1171_v56 = vmul.f32 %v2783_v45, %v1154_v3  ;;  %v945_v10 = vadd.f32 %v941_v48, %v2779_v43  ;;  %v1155_v25 = vsel %vm1007_vm14, %v1147_v40, 0.0 }
 0x2ac   : > { %v1050_v33 = vadd.f32 %v1046_v19, %v993_v26  ;;  %v1182_v36 = vpop.permute.xlu0 %1181  ;;  %v1172_v4 = vmul.f32 %v2783_v45, %v1155_v25 }
 0x2ad   : > { %v1192_v38 = vsel %vm1191_vm13, %v1180_v55, %v1182_v36  ;;  %v1193_v19 = vsel %vm1191_vm13, %v1182_v36, %v2865_v11  ;;  %v1288_v11 = vsel %vm1287_vm15, %v2916_v39, %v1278_v62 }
 0x2ae   : > { %v1096_v52 = vadd.f32 %v1092_v32, %v1050_v33  ;;  %v1200_v42 = vsel %vm895_vm7, %v1192_v38, 0.0  ;;  %v1201_v6 = vsel %vm896_vm12, %v1193_v19, 0.0  ;;  %v1289_v33 = vsel %vm1287_vm15, %v1278_v62, %v2785_v46 }
 0x2af   : > { %v1217_v55 = vmul.f32 %v2844_v5, %v1200_v42  ;;  %v1218_v37 = vmul.f32 %v2844_v5, %v1201_v6  ;;  %v1296_v44 = vsel %vm1006_vm10, %v1288_v11, 0.0  ;;  %v1297_v45 = vsel %vm1007_vm14, %v1289_v33, 0.0 }
 0x2b0   : > { %v1251_v59 = vpop.permute.xlu0 %1250  ;;  %v1117_v60 = vadd.f32 %v1113_v35, %v1096_v52  ;;  %v1313_v62 = vmul.f32 %v2858_v9, %v1296_v44  ;;  %v1314_v5 = vmul.f32 %v2858_v9, %v1297_v45 }
 0x2b2   : > { %v1175_v7 = vadd.f32 %v1171_v56, %v1117_v60 }
 0x2b4   : > { %v978_v13 = vpop.permute.xlu0 %977  ;;  %v1221_v17 = vadd.f32 %v1217_v55, %v1175_v7 }
 0x2b5   : > { %v986_v34 = vsel %vm860_vm0, %v976_v15, %v978_v13 }
 0x2b6   : > { %v994_v54 = vadd.f32 %v986_v34, %v945_v10 }
 0x2b8   : > { %v1051_v24 = vadd.f32 %v1047_v0, %v994_v54  ;;  %v912_v43 = vpop.permute.xlu0 %911 }
 0x2b9   : > { %v2975_v26 = vpop.permute.xlu1 %1310  ;;  %v918_v1 = vsel %vm915_vm6, %v2907_v28, %v912_v43 }
 0x2ba   : > { %v1097_v15 = vadd.f32 %v1093_v18, %v1051_v24  ;;  %v926_v9 = vsel %vm895_vm7, %v918_v1, 0.0 }
 0x2bb   : > { %v942_v34 = vmul.f32 %v2871_v14, %v926_v9 }
 0x2bc   : > { %v1063_v12 = vpop.permute.xlu0 %1062  ;;  %v1118_v32 = vadd.f32 %v1114_v63, %v1097_v15 }
 0x2bd   : > { %v2986_v36 = vpop.permute.xlu1 %1189  ;;  %v1069_v0 = vsel %vm1066_vm9, %v2909_v29, %v1063_v12 }
 0x2be   : > { %v1176_v3 = vadd.f32 %v1172_v4, %v1118_v32  ;;  %v1077_v29 = vsel %vm895_vm7, %v1069_v0, 0.0  ;;  %v946_v32 = vadd.f32 %v942_v34, %v2787_v47 }
 0x2c0   : > { %v1140_v51 = vpop.permute.xlu0 %1139  ;;  %v1222_v38 = vadd.f32 %v1218_v37, %v1176_v3 }
 0x2c1   : > { %v1253_v52 = vpop.permute.xlu1 %1252 }
 0x2c2   : > { %v1263_v39 = vsel %vm1262_vm1, %v1251_v59, %v1253_v52  ;;  %v1264_v46 = vsel %vm1262_vm1, %v1253_v52, %v2913_v8 }
 0x2c3   : > { %v1271_v35 = vadd.f32 %v1263_v39, %v1221_v17  ;;  %v1272_v42 = vadd.f32 %v1264_v46, %v1222_v38 }
 0x2c4   : > { %v1019_v48 = vpop.permute.xlu0 %1018 }
 0x2c5   : > { %v2998_v50 = vadd.f32 %v1313_v62, %v1271_v35  ;;  %v3000_v56 = vadd.f32 %v1314_v5, %v1272_v42  ;;  %v1017_v60 = vpop.permute.xlu1 %1016 }
 0x2c6   : > { %v1023_v28 = vsel %vm1020_vm8, %v2905_v27, %v1017_v60  ;;  %v1024_v19 = vsel %vm1020_vm8, %v1017_v60, %v1019_v48 }
 0x2c7   : > { %v1321_v59 = vmul.f32 %v2998_v50, %v2998_v50  ;;  %v1322_v8 = vmul.f32 %v3000_v56, %v3000_v56  ;;  %v1031_v27 = vsel %vm1006_vm10, %v1023_v28, 0.0  ;;  %v1032_v6 = vsel %vm1007_vm14, %v1024_v19, 0.0 }
 0x2c8   : > { %v1142_v55 = vpop.permute.xlu0 %1141  ;;  %v1049_v38 = vmul.f32 %v2879_v16, %v1032_v6 }
 0x2c9   : > { %v1323_v7 = vmul.f32 %v1321_v59, %v2998_v50  ;;  %v1324_v49 = vmul.f32 %v1322_v8, %v3000_v56  ;;  %v914_v10 = vpop.permute.xlu1 %913  ;;  %v1148_v33 = vsel %vm1145_vm11, %v1140_v51, %v1142_v55  ;;  %v1149_v52 = vsel %vm1145_vm11, %v1142_v55, %v2903_v23 }
 0x2ca   : > { %v919_v13 = vsel %vm915_vm6, %v912_v43, %v914_v10  ;;  %v1094_v51 = vmul.f32 %v2894_v20, %v1077_v29  ;;  %v1157_v23 = vsel %vm1007_vm14, %v1149_v52, 0.0 }
 0x2cb   : > { %v1325_v17 = vmul.f32 0.044715, %v1323_v7  ;;  %v1326_v61 = vmul.f32 0.044715, %v1324_v49  ;;  %v927_v40 = vsel %vm896_vm12, %v919_v13, 0.0 }
 0x2cc   : > { %v1188_v54 = vpop.permute.xlu0 %1187  ;;  %v943_v24 = vmul.f32 %v2871_v14, %v927_v40  ;;  %v1048_v14 = vmul.f32 %v2879_v16, %v1031_v27 }
 0x2cd   : > { %v1327_v18 = vadd.f32 %v1325_v17, %v2998_v50  ;;  %v1065_v43 = vpop.permute.xlu1 %1064  ;;  %v1328_v25 = vadd.f32 %v1326_v61, %v3000_v56  ;;  %v1195_v62 = vsel %vm1191_vm13, %v1188_v54, %v2986_v36 }
 0x2ce   : > { %v1070_v63 = vsel %vm1066_vm9, %v1063_v12, %v1065_v43  ;;  %v947_v37 = vadd.f32 %v943_v24, %v2787_v47  ;;  %v1156_v47 = vsel %vm1006_vm10, %v1148_v33, 0.0  ;;  %v1203_v8 = vsel %vm896_vm12, %v1195_v62, 0.0  ;;  %v1341_v33 = vld [vmem:[#allocation17] sm:$0xf] }
 0x2cf   : > { %v1329_v15 = vmul.f32 0.7978846, %v1327_v18  ;;  %v1330_v11 = vmul.f32 0.7978846, %v1328_v25  ;;  %v1078_v12 = vsel %vm896_vm12, %v1070_v63, 0.0  ;;  %v1173_v59 = vmul.f32 %v2901_v22, %v1156_v47 }
 0x2d0   : > { %v984_v4 = vpop.permute.xlu0 %983  ;;  %v1220_v17 = vmul.f32 %v2899_v21, %v1203_v8 }
 0x2d1   : > { %1868 = vtanh.f32 %v1329_v15  ;;  %v982_v3 = vpop.permute.xlu1 %981 }
 0x2d2   : > { %v987_v44 = vsel %vm860_vm0, %v2911_v31, %v982_v3  ;;  %v988_v45 = vsel %vm860_vm0, %v982_v3, %v984_v4  ;;  %1870 = vtanh.f32 %v1330_v11  ;;  %v1095_v31 = vmul.f32 %v2894_v20, %v1078_v12 }
 0x2d3   : > { %v995_v39 = vadd.f32 %v987_v44, %v946_v32  ;;  %v996_v46 = vadd.f32 %v988_v45, %v947_v37  ;;  %v1174_v20 = vmul.f32 %v2901_v22, %v1157_v23  ;;  %vm1348_vm0 = vcmask 64512   ;;  %v1699_v37 = vpop.f32.mrb[0].mxu1 }
 0x2d4   : > { %v1186_v5 = vpop.permute.xlu0 %1185  ;;  %v749_v3 = vpop.f32.mrb[1].mxu1 }
 0x2d5   : > { %v1052_v35 = vadd.f32 %v1048_v14, %v995_v39  ;;  %v1053_v42 = vadd.f32 %v1049_v38, %v996_v46  ;;  %v1194_v16 = vsel %vm1191_vm13, %v1186_v5, %v1188_v54  ;;  %v1284_v48 = vpop.permute.xlu1 %1283  ;;  %v1704_v12 = vpop.f32.mrb[2].mxu1 }
 0x2d6   : > { %v1202_v36 = vsel %vm895_vm7, %v1194_v16, 0.0 }
 0x2d7   : > { %v1098_v60 = vadd.f32 %v1094_v51, %v1052_v35  ;;  %v1099_v1 = vadd.f32 %v1095_v31, %v1053_v42  ;;  %v1219_v61 = vmul.f32 %v2899_v21, %v1202_v36 }
 0x2d8   : > { %v1286_v55 = vpop.permute.xlu0 %1285 }
 0x2d9   : > { %v1291_v9 = vsel %vm1287_vm15, %v1284_v48, %v1286_v55  ;;  %v1259_v7 = vpop.permute.xlu1 %1258  ;;  %v1120_v49 = vadd.f32 %v2806_v58, %v1099_v1  ;;  %v1119_v10 = vadd.f32 %v2804_v57, %v1098_v60 }
 0x2da   : > { %v1299_v41 = vsel %vm1007_vm14, %v1291_v9, 0.0 }
 0x2db   : > { %v1869_v13 = vpop.eup %1868  ;;  %v1178_v2 = vadd.f32 %v1174_v20, %v1120_v49  ;;  %v1177_v28 = vadd.f32 %v1173_v59, %v1119_v10  ;;  %v1316_v24 = vmul.f32 %v2975_v26, %v1299_v41 }
 0x2dc   : > { %v1871_v34 = vpop.eup %1870  ;;  %v1261_v0 = vpop.permute.xlu0 %1260  ;;  %v1333_v22 = vadd.f32 1.0, %v1869_v13 }
 0x2dd   : > { %v1224_v40 = vadd.f32 %v1220_v17, %v1178_v2  ;;  %v1266_v54 = vsel %vm1262_vm1, %v1259_v7, %v1261_v0  ;;  %v1282_v18 = vpop.permute.xlu1 %1281  ;;  %v1223_v58 = vadd.f32 %v1219_v61, %v1177_v28  ;;  %v1334_v19 = vadd.f32 1.0, %v1871_v34 }
 0x2de   : > { %v1290_v57 = vsel %vm1287_vm15, %v1282_v18, %v1284_v48  ;;  %v1335_v30 = vmul.f32 0.5, %v1333_v22 }
 0x2df   : > { %v1274_v43 = vadd.f32 %v1266_v54, %v1224_v40  ;;  %v1298_v21 = vsel %vm1006_vm10, %v1290_v57, 0.0  ;;  %v1336_v25 = vmul.f32 0.5, %v1334_v19 }
 0x2e0   : > { %v1257_v27 = vpop.permute.xlu0 %1256  ;;  %v1315_v6 = vmul.f32 %v2975_v26, %v1298_v21  ;;  %v1337_v14 = vmul.f32 %v1335_v30, %v2998_v50 }
 0x2e1   : > { %v1320_v15 = vadd.f32 %v1316_v24, %v1274_v43  ;;  %v1265_v63 = vsel %vm1262_vm1, %v1257_v27, %v1259_v7  ;;  %v1338_v29 = vmul.f32 %v1336_v25, %v3000_v56  ;;  %v845_v56 = vpop.f32.mrb[3].mxu1  ;;  %v1346_v26 = vpop.permute.xlu1 %1345 }
 0x2e2   : > { %v1273_v4 = vadd.f32 %v1265_v63, %v1223_v58 }
 0x2e3   : > { %v1340_v32 = vmul.f32 %v1338_v29, %v1320_v15 }
 0x2e4   : > { %v1319_v11 = vadd.f32 %v1315_v6, %v1273_v4 }
 0x2e5   : > { %1352 = vmatprep.subr.mxu0 %v1340_v32 }
 0x2e6   : > { %v1339_v53 = vmul.f32 %v1337_v14, %v1319_v11 }
 0x2e8   : > { %1353 = vmatpush1.msra.mxu0 %v1339_v53 }
 0x2e9   : > { %1681 = vmatmul.mubr.msk.f32.vlgmr.msra.gmra.mrb[4].mxu0 %vm1348_vm0, %v1341_v33 }
 0x3bc   : > { %v1418_v44 = vpop.f32.mrb[4].mxu0 }
 0x3bd   : > { %v1419_v45 = vadd.f32 %v1418_v44, %v1346_v26  ;;  %v1420_v38 = vpop.f32.mrb[5].mxu0 }
 0x3be   : > { %v1421_v50 = vadd.f32 %v1420_v38, %v1346_v26 }
 0x3c0   : > { %v1425_v52 = vcombine.low %v1419_v45, %v1421_v50 }
 0x3c2   : > { %1427 = vst [vmem:[%s566_s25] sm:$0xff] %v1425_v52 }
 0x3c3   : > { %2171 = shalt.err (!%p2168_p3)
}
 0x3c4   : > { %s2172_s11 = scalar_lea.hbm %s3080_s20, 128  ;;  %s2176_s26 = scalar_lea.hbm %s3218_s30, 256 }
 0x3c5   : > { %p2173_p12 = scmp.ne.s32.totalorder %s3080_s20, %s2172_s11  ;;  %p2177_p8 = scmp.lt.u32.totalorder %s3080_s20, %s3218_s30 }
 0x3c6   : > { %p2178_p4 = scmp.lt.u32.totalorder %s2176_s26, %s2172_s11  ;;  %p2180_p1 = scmp.lt.u32.totalorder %s2172_s11, %s3080_s20 }
 0x3c7   : > { %p2174_p13 = pnand %p2173_p12, %p3219_p10 }
 0x3c8   : > { %p2179_p7 = por %p2178_p4, %p2177_p8 }
 0x3c9   : > { %p2175_p11 = pneg %p2174_p13 }
 0x3ca   : > { %p2181_p5 = por %p2180_p1, %p2179_p7 }
 0x3cc   : > { %p2182_p9 = pnand %p2181_p5, %p2175_p11 }
 0x3ce   : > { %2185 = shalt.err (!%p2182_p9)
}
 0x3cf   : > { %1739 = dma.vmem_to_hbm [thread:$0]  (%p3219_p10), %s3082_s7, 128, %s3080_s20, %s1429_s3  }
 0x3d0 PF: > { %s3220_s12 = sld [smem:[#allocation28_spill]]  ;;  %s3221_s10 = sld [smem:[#allocation36_spill]] }
 0x3d1   : > { %s3222_s22 = sld [smem:[#allocation31_spill]] }
 0x3d6   : > { %s1457_s1 = sand.u32 1, %s3220_s12   ;;  %p3223_p0 = scmp.ne.s32.totalorder %s3221_s10, 0 }
 0x3d7   : > { %p3224_p6 = scmp.ge.s32.totalorder %s3222_s22, 2  ;;  %s1458_s28 = scalar_lea.sflag [#allocation5], %s1457_s1 }
 0x3d9   : > { %p1774_p2 = pnand %p3224_p6, %p3223_p0 }
 0x3db   : > { %2235 = dma.done.wait (!%p1774_p2), %s1458_s28, 128  }
 0x3dc   : > { %2237 = vsyncadd (!%p1774_p2), %s1458_s28, 4294967168  ;;  %s33_s18 = sadd.s32 1, %s3222_s22   ;;  %s3225_s25 = sld [smem:[#allocation29_spill]] }
 0x3dd   : > { %p30_p3 = scmp.ge.s32.totalorder %s33_s18, 4   ;;  %s3226_s15 = sld [smem:[#allocation35_spill]] }
 0x3de   : > { %s3227_s21 = sld [smem:[#allocation33_spill]]  ;;  %s3228_s13 = smov %s2244_s14 }
 0x3df   : > { %s3230_s16 = smov %s2256_s17  ;;  %32 = sbr.rel (!%p30_p3) target bundleno = 18 (0x12), region = 166 }
 0x3e2   : > { %s3229_s14 = smov %s3225_s25 }
 0x3e4   : > { %s3231_s17 = smov %s3227_s21 }
 0x3e6   :  { %1463 = vsyncpa [#allocation4], 1 }
 0x3e7   :  { %1465 = vsyncpa [#allocation4 + $0x1], 1 }
 0x3e8   :  { %1466 = vsyncpa [#allocation7], 1 }
 0x3e9   :  { %1468 = vsyncpa [#allocation7 + $0x1], 1 }
 0x3ea   :  { %1469 = vsyncpa [#allocation10], 1 }
 0x3eb   :  { %1470 = vsyncpa [#allocation13], 1 }
 0x3ec   :  { %1471 = vsyncpa [#allocation16], 1 }
 0x3ed   :  { %1472 = vsyncpa [#allocation19], 1 }
 0x3ee   :  { %1473 = vsyncpa [#allocation5], 1 }
 0x3ef   :  { %1475 = vsyncpa [#allocation5 + $0x1], 1 }

</bundles_post_ra>
